<compile_context>
chip_gen: v7x
topology: tpu7x:2x2x1
jax: 0.10.0
libtpu: 0.0.40
codegen_flags: <defaults>
</compile_context>

<pallas_src>
import numpy as np
import jax
import jax.numpy as jnp
from jax import lax
from jax.experimental import pallas as pl
from jax.experimental.pallas import tpu as pltpu

_EPS = 1e-5  # PyTorch BatchNorm2d default


# ----------------------------------------------------------------------------
# Parameter repacking: (Cout, Cin, 3, 3) conv weight -> (3, W*Cin, W*Cout) bands.
# B[dy, wi*Cin + ci, wo*Cout + co] = w[co, ci, dy, wi - wo + 1] inside the band,
# so that conv(x)[n, co, h, wo] = sum_dy (X_dy @ B[dy])[n*H + h, wo*Cout + co],
# where X_dy is the dy-shifted (N*H, W*Cin) activation.  Missing band entries
# realize the width-direction zero padding of the conv.
# ----------------------------------------------------------------------------
def _conv_weight_to_band(w_np: np.ndarray, width: int) -> np.ndarray:
    c_out, c_in, kh, kw = w_np.shape
    assert kh == 3 and kw == 3
    band = np.zeros((3, width * c_in, width * c_out), np.float32)
    for dy in range(3):
        for dx in range(3):
            tap = np.ascontiguousarray(w_np[:, :, dy, dx].T)  # (Cin, Cout)
            for wo in range(width):
                wi = wo + dx - 1
                if 0 <= wi < width:
                    band[dy,
                         wi * c_in:(wi + 1) * c_in,
                         wo * c_out:(wo + 1) * c_out] = tap
    return band


# ----------------------------------------------------------------------------
# Fused encoder kernel.
# ----------------------------------------------------------------------------
def _make_encoder_kernel(num_blocks, batch, height, width):
    rows = batch * height  # N*H

    def kernel(*refs):
        x_ref, pool_ref, unpool_ref = refs[0], refs[1], refs[2]
        o_ref = refs[3 + 3 * num_blocks]

        pool = pool_ref[...]      # (W*Cout, Cout) 0/1 channel-pooling matrix (f32)
        unpool = unpool_ref[...]  # (Cout, W*Cout) = pool.T

        # Row index within its image; masks the dy shifts across image boundaries.
        hh = lax.broadcasted_iota(jnp.int32, (rows, 1), 0) % height
        up_valid = hh >= 1
        dn_valid = hh <= height - 2

        cur = x_ref[...]          # (N*H, W*C_in) f32, lane axis packs (w, c)
        for i in range(num_blocks):
            b_ref = refs[3 + 3 * i]    # (3, W*C_in, W*C_out) banded conv weights, bf16
            g_ref = refs[4 + 3 * i]    # (1, W*C_out) gamma, lane-packed, f32
            be_ref = refs[5 + 3 * i]   # (1, W*C_out) beta,  lane-packed, f32

            # --- dy row shifts: XLU rotate + boundary mask (no halo scratch) ---
            up = jnp.where(up_valid, pltpu.roll(cur, shift=1, axis=0), 0.0)
            dn = jnp.where(dn_valid, pltpu.roll(cur, shift=rows - 1, axis=0), 0.0)

            # --- 3x3 conv == 3 banded MXU matmuls, bf16 operands, f32 accum ---
            y = jnp.dot(up.astype(jnp.bfloat16), b_ref[0],
                        preferred_element_type=jnp.float32)
            y += jnp.dot(cur.astype(jnp.bfloat16), b_ref[1],
                         preferred_element_type=jnp.float32)
            y += jnp.dot(dn.astype(jnp.bfloat16), b_ref[2],
                         preferred_element_type=jnp.float32)
            # (conv bias omitted: exactly cancelled by the BN mean subtraction)

            # --- BatchNorm2d (batch stats, biased var): 1 stats pass + 1 affine ---
            count = float(rows * width)                       # N*H*W per channel
            stats = jnp.concatenate(
                [jnp.sum(y, axis=0, keepdims=True),
                 jnp.sum(y * y, axis=0, keepdims=True)], axis=0)      # (2, W*Cout)
            stats_c = jnp.dot(stats, pool,
                              preferred_element_type=jnp.float32) / count  # (2, Cout)
            mean_c = stats_c[0:1, :]
            var_c = stats_c[1:2, :] - mean_c * mean_c
            inv_c = lax.rsqrt(var_c + _EPS)
            packed = jnp.dot(jnp.concatenate([mean_c, inv_c], axis=0), unpool,
                             preferred_element_type=jnp.float32)       # (2, W*Cout)
            scale_l = packed[1:2, :] * g_ref[...]             # gamma / sqrt(var+eps)
            shift_l = be_ref[...] - packed[0:1, :] * scale_l  # beta - mean*scale
            cur = jnp.maximum(y * scale_l + shift_l, 0.0)     # fused affine + ReLU

        o_ref[...] = cur  # (N*H, W*Cout): full-128-lane, unmasked store

    return kernel


# ----------------------------------------------------------------------------
# Wrapper: layout plumbing + the single fused pallas_call.
# ----------------------------------------------------------------------------
def encoder_forward(x_nchw, params):
    batch, c0, height, width = x_nchw.shape
    num_blocks = len(params)
    c_out = params[0]["band"].shape[2] // width
    rows = batch * height

    # NCHW -> (N*H, W*Cin): packed (w, c) on the lane axis.
    x2d = jnp.transpose(x_nchw, (0, 2, 3, 1)).reshape(rows, width * c0)

    # Constant channel pooling / un-pooling matrices for per-channel BN stats over
    # the packed (w, c) lane axis (kept f32: the stats matmuls are tiny M=2 pushes
    # and f32 keeps the sums exact).
    pool = jnp.tile(jnp.eye(c_out, dtype=jnp.float32), (width, 1))  # (W*Cout, Cout)
    unpool = pool.T                                                 # (Cout, W*Cout)

    inputs = [x2d, pool, unpool]
    in_specs = [
        pl.BlockSpec((rows, width * c0), lambda: (0, 0)),
        pl.BlockSpec((width * c_out, c_out), lambda: (0, 0)),
        pl.BlockSpec((c_out, width * c_out), lambda: (0, 0)),
    ]
    c_in = c0
    for blk in params:
        gamma_l = jnp.tile(blk["gamma"], width).reshape(1, width * c_out)
        beta_l = jnp.tile(blk["beta"], width).reshape(1, width * c_out)
        inputs += [blk["band"], gamma_l, beta_l]   # band already bf16
        in_specs += [
            pl.BlockSpec((3, width * c_in, width * c_out), lambda: (0, 0, 0)),
            pl.BlockSpec((1, width * c_out), lambda: (0, 0)),
            pl.BlockSpec((1, width * c_out), lambda: (0, 0)),
        ]
        c_in = c_out

    out2d = pl.pallas_call(
        _make_encoder_kernel(num_blocks, batch, height, width),
        out_shape=jax.ShapeDtypeStruct((rows, width * c_out), jnp.float32),
        in_specs=in_specs,
        out_specs=pl.BlockSpec((rows, width * c_out), lambda: (0, 0)),
        compiler_params=pltpu.CompilerParams(vmem_limit_bytes=32 * 1024 * 1024),
    )(*inputs)

    # (N*H, W*Cout) -> NCHW
    return jnp.transpose(out2d.reshape(batch, height, width, c_out), (0, 3, 1, 2))


# ----------------------------------------------------------------------------
# Parameter init (PyTorch-shaped raw weights + precomputed bf16 banded weights).
# ----------------------------------------------------------------------------
def init_encoder_params(key, in_size, out_size, width, n_blocks=2, ks=3):
    params = []
    c_in = in_size
    for _ in range(n_blocks):
        key, k_w, k_b = jax.random.split(key, 3)
        fan_in = c_in * ks * ks
        std = (2.0 / fan_in) ** 0.5                      # kaiming (fan_in, relu)
        wgt = std * jax.random.normal(k_w, (out_size, c_in, ks, ks), jnp.float32)
        bound = 1.0 / np.sqrt(fan_in)
        bias = jax.random.uniform(k_b, (out_size,), jnp.float32, -bound, bound)
        params.append({
            "w": wgt,    # (Cout, Cin, 3, 3) PyTorch layout (used by the reference)
            "b": bias,   # conv bias: reference only; cancelled by training-mode BN
            "band": jnp.asarray(_conv_weight_to_band(np.asarray(wgt), width),
                                dtype=jnp.bfloat16),     # bf16 MXU weights
            "gamma": jnp.ones((out_size,), jnp.float32),
            "beta": jnp.zeros((out_size,), jnp.float32),
        })
        c_in = out_size
    return params


# ----------------------------------------------------------------------------
# Pure-JAX f32 reference (includes the conv bias; the kernel drops it -> same
# result under training-mode BN).
# ----------------------------------------------------------------------------
def encoder_reference(x_nchw, params):
    x = x_nchw
    for blk in params:
        y = lax.conv_general_dilated(
            x, blk["w"], window_strides=(1, 1), padding=((1, 1), (1, 1)),
            dimension_numbers=("NCHW", "OIHW", "NCHW"))
        y = y + blk["b"].reshape(1, -1, 1, 1)
        mean = jnp.mean(y, axis=(0, 2, 3), keepdims=True)
        var = jnp.mean((y - mean) ** 2, axis=(0, 2, 3), keepdims=True)
        y = (y - mean) * lax.rsqrt(var + _EPS)
        y = y * blk["gamma"].reshape(1, -1, 1, 1) + blk["beta"].reshape(1, -1, 1, 1)
        x = jnp.maximum(y, 0.0)
    return x


if __name__ == "__main__":
    key = jax.random.PRNGKey(0)
    N, C_IN, H, W = 2, 4, 16, 16
    C_OUT = 8

    key, kx = jax.random.split(key)
    x = jax.random.normal(kx, (N, C_IN, H, W), jnp.float32)
    params = init_encoder_params(key, C_IN, C_OUT, width=W, n_blocks=2)

    out = jax.jit(encoder_forward)(x, params)
    out = jax.block_until_ready(out)

    ref = encoder_reference(x, params)
    assert out.shape == (N, C_OUT, H, W), out.shape
    max_err = float(jnp.max(jnp.abs(out - ref)))
    # bf16 conv operands -> looser tolerance than the old f32-exact check.
    assert jnp.allclose(out, ref, atol=5e-2, rtol=5e-2), (
        f"mismatch vs reference, max abs err = {max_err}")
    print("KERNEL_OK")
</pallas_src>

<mosaic_0001>
module attributes {stable_mosaic.version = 11 : i64} {
  func.func @kernel(%arg0: memref<32x64xf32, #tpu.memory_space<vmem>>, %arg1: memref<128x8xf32, #tpu.memory_space<vmem>>, %arg2: memref<8x128xf32, #tpu.memory_space<vmem>>, %arg3: memref<3x64x128xbf16, #tpu.memory_space<vmem>>, %arg4: memref<1x128xf32, #tpu.memory_space<vmem>>, %arg5: memref<1x128xf32, #tpu.memory_space<vmem>>, %arg6: memref<3x128x128xbf16, #tpu.memory_space<vmem>>, %arg7: memref<1x128xf32, #tpu.memory_space<vmem>>, %arg8: memref<1x128xf32, #tpu.memory_space<vmem>>, %arg9: memref<32x128xf32, #tpu.memory_space<vmem>>) attributes {dimension_semantics = [], scalar_prefetch = 0 : i64, scratch_operands = 0 : i64, tpu.core_type = #tpu.core_type<tc>} {
    %c0 = arith.constant 0 : index
    %c0_0 = arith.constant 0 : index
    %0 = vector.load %arg1[%c0, %c0_0] : memref<128x8xf32, #tpu.memory_space<vmem>>, vector<128x8xf32>
    %c0_1 = arith.constant 0 : index
    %c0_2 = arith.constant 0 : index
    %1 = vector.load %arg2[%c0_1, %c0_2] : memref<8x128xf32, #tpu.memory_space<vmem>>, vector<8x128xf32>
    %2 = tpu.iota {dimensions = array<i32: 0>} : vector<32x1xi32>
    %c16_i32 = arith.constant 16 : i32
    %c0_i32 = arith.constant 0 : i32
    %3 = arith.cmpi eq, %c16_i32, %c0_i32 : i32
    %c1_i32 = arith.constant 1 : i32
    %4 = arith.select %3, %c1_i32, %c16_i32 : i32
    %5 = vector.broadcast %4 : i32 to vector<32x1xi32>
    %6 = arith.remsi %2, %5 : vector<32x1xi32>
    %c0_i32_3 = arith.constant 0 : i32
    %7 = vector.broadcast %c0_i32_3 : i32 to vector<32x1xi32>
    %8 = arith.cmpi ne, %6, %7 : vector<32x1xi32>
    %c0_i32_4 = arith.constant 0 : i32
    %9 = vector.broadcast %c0_i32_4 : i32 to vector<32x1xi32>
    %10 = arith.cmpi slt, %6, %9 : vector<32x1xi32>
    %c0_i32_5 = arith.constant 0 : i32
    %11 = arith.cmpi slt, %4, %c0_i32_5 : i32
    %12 = vector.broadcast %11 : i1 to vector<32x1xi1>
    %13 = vector.broadcast %12 : vector<32x1xi1> to vector<32x1xi1>
    %14 = arith.xori %10, %13 : vector<32x1xi1>
    %15 = arith.andi %14, %8 : vector<32x1xi1>
    %16 = vector.broadcast %4 : i32 to vector<32x1xi32>
    %17 = arith.addi %6, %16 : vector<32x1xi32>
    %18 = arith.select %15, %17, %6 : vector<32x1xi1>, vector<32x1xi32>
    %c1_i32_6 = arith.constant 1 : i32
    %19 = vector.broadcast %c1_i32_6 : i32 to vector<32x1xi32>
    %20 = arith.cmpi sge, %18, %19 : vector<32x1xi32>
    %c14_i32 = arith.constant 14 : i32
    %21 = vector.broadcast %c14_i32 : i32 to vector<32x1xi32>
    %22 = arith.cmpi sle, %18, %21 : vector<32x1xi32>
    %c0_7 = arith.constant 0 : index
    %c0_8 = arith.constant 0 : index
    %23 = vector.load %arg0[%c0_7, %c0_8] : memref<32x64xf32, #tpu.memory_space<vmem>>, vector<32x64xf32>
    %c1_i32_9 = arith.constant 1 : i32
    %24 = tpu.dynamic_rotate %23 by %c1_i32_9 dim 0 : vector<32x64xf32>, i32 -> vector<32x64xf32>
    %cst = arith.constant 0.000000e+00 : f32
    %25 = vector.shape_cast %20 : vector<32x1xi1> to vector<32x1xi1>
    %26 = vector.broadcast %25 : vector<32x1xi1> to vector<32x64xi1>
    %27 = vector.broadcast %cst : f32 to vector<32x64xf32>
    %28 = arith.select %26, %24, %27 : vector<32x64xi1>, vector<32x64xf32>
    %c31_i32 = arith.constant 31 : i32
    %29 = tpu.dynamic_rotate %23 by %c31_i32 dim 0 : vector<32x64xf32>, i32 -> vector<32x64xf32>
    %cst_10 = arith.constant 0.000000e+00 : f32
    %30 = vector.shape_cast %22 : vector<32x1xi1> to vector<32x1xi1>
    %31 = vector.broadcast %30 : vector<32x1xi1> to vector<32x64xi1>
    %32 = vector.broadcast %cst_10 : f32 to vector<32x64xf32>
    %33 = arith.select %31, %29, %32 : vector<32x64xi1>, vector<32x64xf32>
    %34 = arith.truncf %28 : vector<32x64xf32> to vector<32x64xbf16>
    %c0_11 = arith.constant 0 : index
    %c0_12 = arith.constant 0 : index
    %c0_13 = arith.constant 0 : index
    %35 = vector.load %arg3[%c0_11, %c0_12, %c0_13] : memref<3x64x128xbf16, #tpu.memory_space<vmem>>, vector<1x64x128xbf16>
    %36 = vector.shape_cast %35 : vector<1x64x128xbf16> to vector<64x128xbf16>
    %cst_14 = arith.constant dense<0.000000e+00> : vector<32x128xf32>
    %37 = tpu.matmul %34, %36, %cst_14 {dimension_numbers = #tpu.dot_dimension_numbers<[1], [0], [0], [1], [0, 0, 1, 1], [], []>} : vector<32x64xbf16>, vector<64x128xbf16>, vector<32x128xf32> -> vector<32x128xf32>
    %38 = arith.truncf %23 : vector<32x64xf32> to vector<32x64xbf16>
    %c1 = arith.constant 1 : index
    %c0_15 = arith.constant 0 : index
    %c0_16 = arith.constant 0 : index
    %39 = vector.load %arg3[%c1, %c0_15, %c0_16] : memref<3x64x128xbf16, #tpu.memory_space<vmem>>, vector<1x64x128xbf16>
    %40 = vector.shape_cast %39 : vector<1x64x128xbf16> to vector<64x128xbf16>
    %cst_17 = arith.constant dense<0.000000e+00> : vector<32x128xf32>
    %41 = tpu.matmul %38, %40, %cst_17 {dimension_numbers = #tpu.dot_dimension_numbers<[1], [0], [0], [1], [0, 0, 1, 1], [], []>} : vector<32x64xbf16>, vector<64x128xbf16>, vector<32x128xf32> -> vector<32x128xf32>
    %42 = arith.addf %37, %41 : vector<32x128xf32>
    %43 = arith.truncf %33 : vector<32x64xf32> to vector<32x64xbf16>
    %c2 = arith.constant 2 : index
    %c0_18 = arith.constant 0 : index
    %c0_19 = arith.constant 0 : index
    %44 = vector.load %arg3[%c2, %c0_18, %c0_19] : memref<3x64x128xbf16, #tpu.memory_space<vmem>>, vector<1x64x128xbf16>
    %45 = vector.shape_cast %44 : vector<1x64x128xbf16> to vector<64x128xbf16>
    %cst_20 = arith.constant dense<0.000000e+00> : vector<32x128xf32>
    %46 = tpu.matmul %43, %45, %cst_20 {dimension_numbers = #tpu.dot_dimension_numbers<[1], [0], [0], [1], [0, 0, 1, 1], [], []>} : vector<32x64xbf16>, vector<64x128xbf16>, vector<32x128xf32> -> vector<32x128xf32>
    %47 = arith.addf %42, %46 : vector<32x128xf32>
    %cst_21 = arith.constant dense<0.000000e+00> : vector<128xf32>
    %48 = vector.multi_reduction <add>, %47, %cst_21 [0] : vector<32x128xf32> to vector<128xf32>
    %49 = vector.shape_cast %48 : vector<128xf32> to vector<1x128xf32>
    %50 = arith.mulf %47, %47 : vector<32x128xf32>
    %cst_22 = arith.constant dense<0.000000e+00> : vector<128xf32>
    %51 = vector.multi_reduction <add>, %50, %cst_22 [0] : vector<32x128xf32> to vector<128xf32>
    %52 = vector.shape_cast %51 : vector<128xf32> to vector<1x128xf32>
    %53 = tpu.concatenate %49, %52 in 0 : vector<1x128xf32>, vector<1x128xf32> -> vector<2x128xf32>
    %cst_23 = arith.constant dense<0.000000e+00> : vector<2x8xf32>
    %54 = tpu.matmul %53, %0, %cst_23 {dimension_numbers = #tpu.dot_dimension_numbers<[1], [0], [0], [1], [0, 0, 1, 1], [], []>} : vector<2x128xf32>, vector<128x8xf32>, vector<2x8xf32> -> vector<2x8xf32>
    %cst_24 = arith.constant 5.120000e+02 : f32
    %55 = vector.broadcast %cst_24 : f32 to vector<2x8xf32>
    %56 = arith.divf %54, %55 : vector<2x8xf32>
    %57 = vector.extract_strided_slice %56 {offsets = [0, 0], sizes = [1, 8], strides = [1, 1]} : vector<2x8xf32> to vector<1x8xf32>
    %58 = vector.extract_strided_slice %56 {offsets = [1, 0], sizes = [1, 8], strides = [1, 1]} : vector<2x8xf32> to vector<1x8xf32>
    %59 = arith.mulf %57, %57 : vector<1x8xf32>
    %60 = arith.subf %58, %59 : vector<1x8xf32>
    %cst_25 = arith.constant 9.99999974E-6 : f32
    %61 = vector.broadcast %cst_25 : f32 to vector<1x8xf32>
    %62 = arith.addf %60, %61 : vector<1x8xf32>
    %63 = math.rsqrt %62 : vector<1x8xf32>
    %64 = tpu.concatenate %57, %63 in 0 : vector<1x8xf32>, vector<1x8xf32> -> vector<2x8xf32>
    %cst_26 = arith.constant dense<0.000000e+00> : vector<2x128xf32>
    %65 = tpu.matmul %64, %1, %cst_26 {dimension_numbers = #tpu.dot_dimension_numbers<[1], [0], [0], [1], [0, 0, 1, 1], [], []>} : vector<2x8xf32>, vector<8x128xf32>, vector<2x128xf32> -> vector<2x128xf32>
    %66 = vector.extract_strided_slice %65 {offsets = [1, 0], sizes = [1, 128], strides = [1, 1]} : vector<2x128xf32> to vector<1x128xf32>
    %c0_27 = arith.constant 0 : index
    %c0_28 = arith.constant 0 : index
    %67 = vector.load %arg4[%c0_27, %c0_28] : memref<1x128xf32, #tpu.memory_space<vmem>>, vector<1x128xf32>
    %68 = arith.mulf %66, %67 : vector<1x128xf32>
    %c0_29 = arith.constant 0 : index
    %c0_30 = arith.constant 0 : index
    %69 = vector.load %arg5[%c0_29, %c0_30] : memref<1x128xf32, #tpu.memory_space<vmem>>, vector<1x128xf32>
    %70 = vector.extract_strided_slice %65 {offsets = [0, 0], sizes = [1, 128], strides = [1, 1]} : vector<2x128xf32> to vector<1x128xf32>
    %71 = arith.mulf %70, %68 : vector<1x128xf32>
    %72 = arith.subf %69, %71 : vector<1x128xf32>
    %73 = vector.broadcast %68 : vector<1x128xf32> to vector<32x128xf32>
    %74 = arith.mulf %47, %73 : vector<32x128xf32>
    %75 = vector.broadcast %72 : vector<1x128xf32> to vector<32x128xf32>
    %76 = arith.addf %74, %75 : vector<32x128xf32>
    %cst_31 = arith.constant 0.000000e+00 : f32
    %77 = vector.broadcast %cst_31 : f32 to vector<32x128xf32>
    %78 = arith.maximumf %76, %77 : vector<32x128xf32>
    %c1_i32_32 = arith.constant 1 : i32
    %79 = tpu.dynamic_rotate %78 by %c1_i32_32 dim 0 : vector<32x128xf32>, i32 -> vector<32x128xf32>
    %cst_33 = arith.constant 0.000000e+00 : f32
    %80 = vector.shape_cast %20 : vector<32x1xi1> to vector<32x1xi1>
    %81 = vector.broadcast %80 : vector<32x1xi1> to vector<32x128xi1>
    %82 = vector.broadcast %cst_33 : f32 to vector<32x128xf32>
    %83 = arith.select %81, %79, %82 : vector<32x128xi1>, vector<32x128xf32>
    %c31_i32_34 = arith.constant 31 : i32
    %84 = tpu.dynamic_rotate %78 by %c31_i32_34 dim 0 : vector<32x128xf32>, i32 -> vector<32x128xf32>
    %cst_35 = arith.constant 0.000000e+00 : f32
    %85 = vector.shape_cast %22 : vector<32x1xi1> to vector<32x1xi1>
    %86 = vector.broadcast %85 : vector<32x1xi1> to vector<32x128xi1>
    %87 = vector.broadcast %cst_35 : f32 to vector<32x128xf32>
    %88 = arith.select %86, %84, %87 : vector<32x128xi1>, vector<32x128xf32>
    %89 = arith.truncf %83 : vector<32x128xf32> to vector<32x128xbf16>
    %c0_36 = arith.constant 0 : index
    %c0_37 = arith.constant 0 : index
    %c0_38 = arith.constant 0 : index
    %90 = vector.load %arg6[%c0_36, %c0_37, %c0_38] : memref<3x128x128xbf16, #tpu.memory_space<vmem>>, vector<1x128x128xbf16>
    %91 = vector.shape_cast %90 : vector<1x128x128xbf16> to vector<128x128xbf16>
    %cst_39 = arith.constant dense<0.000000e+00> : vector<32x128xf32>
    %92 = tpu.matmul %89, %91, %cst_39 {dimension_numbers = #tpu.dot_dimension_numbers<[1], [0], [0], [1], [0, 0, 1, 1], [], []>} : vector<32x128xbf16>, vector<128x128xbf16>, vector<32x128xf32> -> vector<32x128xf32>
    %93 = arith.truncf %78 : vector<32x128xf32> to vector<32x128xbf16>
    %c1_40 = arith.constant 1 : index
    %c0_41 = arith.constant 0 : index
    %c0_42 = arith.constant 0 : index
    %94 = vector.load %arg6[%c1_40, %c0_41, %c0_42] : memref<3x128x128xbf16, #tpu.memory_space<vmem>>, vector<1x128x128xbf16>
    %95 = vector.shape_cast %94 : vector<1x128x128xbf16> to vector<128x128xbf16>
    %cst_43 = arith.constant dense<0.000000e+00> : vector<32x128xf32>
    %96 = tpu.matmul %93, %95, %cst_43 {dimension_numbers = #tpu.dot_dimension_numbers<[1], [0], [0], [1], [0, 0, 1, 1], [], []>} : vector<32x128xbf16>, vector<128x128xbf16>, vector<32x128xf32> -> vector<32x128xf32>
    %97 = arith.addf %92, %96 : vector<32x128xf32>
    %98 = arith.truncf %88 : vector<32x128xf32> to vector<32x128xbf16>
    %c2_44 = arith.constant 2 : index
    %c0_45 = arith.constant 0 : index
    %c0_46 = arith.constant 0 : index
    %99 = vector.load %arg6[%c2_44, %c0_45, %c0_46] : memref<3x128x128xbf16, #tpu.memory_space<vmem>>, vector<1x128x128xbf16>
    %100 = vector.shape_cast %99 : vector<1x128x128xbf16> to vector<128x128xbf16>
    %cst_47 = arith.constant dense<0.000000e+00> : vector<32x128xf32>
    %101 = tpu.matmul %98, %100, %cst_47 {dimension_numbers = #tpu.dot_dimension_numbers<[1], [0], [0], [1], [0, 0, 1, 1], [], []>} : vector<32x128xbf16>, vector<128x128xbf16>, vector<32x128xf32> -> vector<32x128xf32>
    %102 = arith.addf %97, %101 : vector<32x128xf32>
    %cst_48 = arith.constant dense<0.000000e+00> : vector<128xf32>
    %103 = vector.multi_reduction <add>, %102, %cst_48 [0] : vector<32x128xf32> to vector<128xf32>
    %104 = vector.shape_cast %103 : vector<128xf32> to vector<1x128xf32>
    %105 = arith.mulf %102, %102 : vector<32x128xf32>
    %cst_49 = arith.constant dense<0.000000e+00> : vector<128xf32>
    %106 = vector.multi_reduction <add>, %105, %cst_49 [0] : vector<32x128xf32> to vector<128xf32>
    %107 = vector.shape_cast %106 : vector<128xf32> to vector<1x128xf32>
    %108 = tpu.concatenate %104, %107 in 0 : vector<1x128xf32>, vector<1x128xf32> -> vector<2x128xf32>
    %cst_50 = arith.constant dense<0.000000e+00> : vector<2x8xf32>
    %109 = tpu.matmul %108, %0, %cst_50 {dimension_numbers = #tpu.dot_dimension_numbers<[1], [0], [0], [1], [0, 0, 1, 1], [], []>} : vector<2x128xf32>, vector<128x8xf32>, vector<2x8xf32> -> vector<2x8xf32>
    %cst_51 = arith.constant 5.120000e+02 : f32
    %110 = vector.broadcast %cst_51 : f32 to vector<2x8xf32>
    %111 = arith.divf %109, %110 : vector<2x8xf32>
    %112 = vector.extract_strided_slice %111 {offsets = [0, 0], sizes = [1, 8], strides = [1, 1]} : vector<2x8xf32> to vector<1x8xf32>
    %113 = vector.extract_strided_slice %111 {offsets = [1, 0], sizes = [1, 8], strides = [1, 1]} : vector<2x8xf32> to vector<1x8xf32>
    %114 = arith.mulf %112, %112 : vector<1x8xf32>
    %115 = arith.subf %113, %114 : vector<1x8xf32>
    %cst_52 = arith.constant 9.99999974E-6 : f32
    %116 = vector.broadcast %cst_52 : f32 to vector<1x8xf32>
    %117 = arith.addf %115, %116 : vector<1x8xf32>
    %118 = math.rsqrt %117 : vector<1x8xf32>
    %119 = tpu.concatenate %112, %118 in 0 : vector<1x8xf32>, vector<1x8xf32> -> vector<2x8xf32>
    %cst_53 = arith.constant dense<0.000000e+00> : vector<2x128xf32>
    %120 = tpu.matmul %119, %1, %cst_53 {dimension_numbers = #tpu.dot_dimension_numbers<[1], [0], [0], [1], [0, 0, 1, 1], [], []>} : vector<2x8xf32>, vector<8x128xf32>, vector<2x128xf32> -> vector<2x128xf32>
    %121 = vector.extract_strided_slice %120 {offsets = [1, 0], sizes = [1, 128], strides = [1, 1]} : vector<2x128xf32> to vector<1x128xf32>
    %c0_54 = arith.constant 0 : index
    %c0_55 = arith.constant 0 : index
    %122 = vector.load %arg7[%c0_54, %c0_55] : memref<1x128xf32, #tpu.memory_space<vmem>>, vector<1x128xf32>
    %123 = arith.mulf %121, %122 : vector<1x128xf32>
    %c0_56 = arith.constant 0 : index
    %c0_57 = arith.constant 0 : index
    %124 = vector.load %arg8[%c0_56, %c0_57] : memref<1x128xf32, #tpu.memory_space<vmem>>, vector<1x128xf32>
    %125 = vector.extract_strided_slice %120 {offsets = [0, 0], sizes = [1, 128], strides = [1, 1]} : vector<2x128xf32> to vector<1x128xf32>
    %126 = arith.mulf %125, %123 : vector<1x128xf32>
    %127 = arith.subf %124, %126 : vector<1x128xf32>
    %128 = vector.broadcast %123 : vector<1x128xf32> to vector<32x128xf32>
    %129 = arith.mulf %102, %128 : vector<32x128xf32>
    %130 = vector.broadcast %127 : vector<1x128xf32> to vector<32x128xf32>
    %131 = arith.addf %129, %130 : vector<32x128xf32>
    %cst_58 = arith.constant 0.000000e+00 : f32
    %132 = vector.broadcast %cst_58 : f32 to vector<32x128xf32>
    %133 = arith.maximumf %131, %132 : vector<32x128xf32>
    %c0_59 = arith.constant 0 : index
    %c0_60 = arith.constant 0 : index
    %134 = vector.load %arg9[%c0_59, %c0_60] : memref<32x128xf32, #tpu.memory_space<vmem>>, vector<32x128xf32>
    tpu.vector_store %arg9[%c0_59, %c0_60], %133 {strides = array<i32>} : memref<32x128xf32, #tpu.memory_space<vmem>>, vector<32x128xf32>,
    return
  }
}

</mosaic_0001>

<bundles_post_ra>
// kernel: tile.38
= control target key start
LH: loop header
LB: loop body
LE: loop exit
PB: predicated region body
PF: predicated region fallthrough
CT: control target
= control target key end

     0   :  { %s28_s0 = inlined_call_operand.vmem [shape: f32[8], index: 0, kind: input, shape index: {}]   ;;  %s29_s1 = inlined_call_operand.vmem [shape: f32[16,8], index: 1, kind: output, shape index: {}]  }
   0x1   :  { %v4_v0 = vld [vmem:[%s28_s0] ss:$0 sm:$0xff] }
   0x2   :  { %5 = vst [vmem:[%s29_s1] sm:$0xff] %v4_v0  ;;  %8 = vst [vmem:[%s29_s1 + $0x8] sm:$0xff] %v4_v0 }

// kernel: tile.39
= control target key start
LH: loop header
LB: loop body
LE: loop exit
PB: predicated region body
PF: predicated region fallthrough
CT: control target
= control target key end

     0   :  { %s131_s10 = smov 120   ;;  %s132_s11 = smov 104   ;;  %vm3_vm0 = vcmask 64512   ;;  %vm9_vm1 = vcmask 1048512   ;;  %vm15_vm2 = vcmask 982912   ;;  %vm21_vm3 = vcmask 917312   ;;  %s207_s0 = inlined_call_operand.vmem [shape: f32[16,8], index: 0, kind: input, shape index: {}]   ;;  %s208_s1 = inlined_call_operand.vmem [shape: f32[1,128], index: 1, kind: output, shape index: {}]  }
   0x1   :  { %v101_v0 = vld [vmem:[%s207_s0 + $0xf] sm:$0x1]   ;;  %v103_v1 = vld [vmem:[%s207_s0 + $0xd] sm:$0x1]   ;;  %v102_v2 = vld [vmem:[%s207_s0 + $0xe] sm:$0x1]  }
   0x2   :  { %7 = vrot.lane.b32.xlu0 %v101_v0, %s131_s10  ;;  %19 = vrot.lane.b32.xlu1 %v103_v1, %s132_s11  ;;  %v104_v3 = vld [vmem:[%s207_s0 + $0xc] sm:$0x1]   ;;  %s133_s16 = smov 112   ;;  %s134_s17 = smov 96   ;;  %v105_v4 = vld [vmem:[%s207_s0 + $0xb] sm:$0x1]  }
   0x3   :  { %v106_v5 = vld [vmem:[%s207_s0 + $0xa] sm:$0x1]   ;;  %v2_v6 = vld [vmem:[%s207_s0] sm:$0x1]   ;;  %s135_s24 = smov 88   ;;  %s136_s25 = smov 80  }
   0x4   :  { %4 = vst.msk [vmem:[#allocation0] sm:$0x1] %vm3_vm0, %v2_v6   ;;  %v107_v7 = vld [vmem:[%s207_s0 + $0x9] sm:$0x1]   ;;  %v108_v8 = vld [vmem:[%s207_s0 + $0x8] sm:$0x1]  }
   0x5   :  { %s137_s30 = smov 72   ;;  %s138_s2 = smov 64   ;;  %v109_v9 = vld [vmem:[%s207_s0 + $0x7] sm:$0x1]   ;;  %v110_v10 = vld [vmem:[%s207_s0 + $0x6] sm:$0x1]  }
   0x6   :  { %13 = vrot.lane.b32.xlu0 %v102_v2, %s133_s16  ;;  %25 = vrot.lane.b32.xlu1 %v104_v3, %s134_s17  ;;  %s139_s7 = smov 56   ;;  %s140_s8 = smov 48   ;;  %v111_v11 = vld [vmem:[%s207_s0 + $0x5] sm:$0x1]   ;;  %v112_v12 = vld [vmem:[%s207_s0 + $0x4] sm:$0x1]  }
   0x7   :  { %s141_s13 = smov 40   ;;  %s142_s14 = smov 32   ;;  %v113_v13 = vld [vmem:[%s207_s0 + $0x3] sm:$0x1]   ;;  %v114_v14 = vld [vmem:[%s207_s0 + $0x2] sm:$0x1]  }
   0x8   :  { %s143_s19 = smov 24   ;;  %s144_s20 = smov 16   ;;  %v115_v15 = vld [vmem:[%s207_s0 + $0x1] sm:$0x1]   ;;  %vm27_vm4 = vcmask 851712   ;;  %vm33_vm5 = vcmask 786112  }
   0x9   :  { %s145_s0 = smov 8   ;;  %vm39_vm6 = vcmask 720512   ;;  %vm45_vm7 = vcmask 654912   ;;  %vm51_vm8 = vcmask 589312   ;;  %vm57_vm9 = vcmask 523712  }
   0xa   :  { %31 = vrot.lane.b32.xlu0 %v105_v4, %s135_s24  ;;  %37 = vrot.lane.b32.xlu1 %v106_v5, %s136_s25  ;;  %vm63_vm10 = vcmask 458112   ;;  %vm69_vm11 = vcmask 392512   ;;  %vm75_vm12 = vcmask 326912   ;;  %vm81_vm13 = vcmask 261312  }
   0xb   :  { %vm87_vm14 = vcmask 195712   ;;  %vm93_vm15 = vcmask 130112  }
   0xe   :  { %43 = vrot.lane.b32.xlu0 %v107_v7, %s137_s30  ;;  %49 = vrot.lane.b32.xlu1 %v108_v8, %s138_s2 }
  0x12   :  { %55 = vrot.lane.b32.xlu0 %v109_v9, %s139_s7  ;;  %61 = vrot.lane.b32.xlu1 %v110_v10, %s140_s8 }
  0x16   :  { %67 = vrot.lane.b32.xlu0 %v111_v11, %s141_s13  ;;  %73 = vrot.lane.b32.xlu1 %v112_v12, %s142_s14 }
  0x1a   :  { %79 = vrot.lane.b32.xlu0 %v113_v13, %s143_s19  ;;  %85 = vrot.lane.b32.xlu1 %v114_v14, %s144_s20 }
  0x1e   :  { %91 = vrot.lane.b32.xlu0 %v115_v15, %s145_s0 }
  0x74   :  { %v8_v16 = vpop.permute.xlu0 %7   ;;  %v20_v17 = vpop.permute.xlu1 %19  }
  0x75   :  { %10 = vst.msk [vmem:[#allocation0] sm:$0x1] %vm9_vm1, %v8_v16  }
  0x78   :  { %v14_v18 = vpop.permute.xlu0 %13   ;;  %v26_v19 = vpop.permute.xlu1 %25  }
  0x79   :  { %16 = vst.msk [vmem:[#allocation0] sm:$0x1] %vm15_vm2, %v14_v18  }
  0x7a   :  { %22 = vst.msk [vmem:[#allocation0] sm:$0x1] %vm21_vm3, %v20_v17  }
  0x7b   :  { %28 = vst.msk [vmem:[#allocation0] sm:$0x1] %vm27_vm4, %v26_v19  }
  0x7c   :  { %v32_v20 = vpop.permute.xlu0 %31   ;;  %v38_v21 = vpop.permute.xlu1 %37  }
  0x7d   :  { %34 = vst.msk [vmem:[#allocation0] sm:$0x1] %vm33_vm5, %v32_v20  }
  0x7e   :  { %40 = vst.msk [vmem:[#allocation0] sm:$0x1] %vm39_vm6, %v38_v21  }
  0x80   :  { %v44_v22 = vpop.permute.xlu0 %43   ;;  %v50_v23 = vpop.permute.xlu1 %49  }
  0x81   :  { %46 = vst.msk [vmem:[#allocation0] sm:$0x1] %vm45_vm7, %v44_v22  }
  0x82   :  { %52 = vst.msk [vmem:[#allocation0] sm:$0x1] %vm51_vm8, %v50_v23  }
  0x84   :  { %v56_v24 = vpop.permute.xlu0 %55   ;;  %v62_v25 = vpop.permute.xlu1 %61  }
  0x85   :  { %58 = vst.msk [vmem:[#allocation0] sm:$0x1] %vm57_vm9, %v56_v24  }
  0x86   :  { %64 = vst.msk [vmem:[#allocation0] sm:$0x1] %vm63_vm10, %v62_v25  }
  0x88   :  { %v68_v26 = vpop.permute.xlu0 %67   ;;  %v74_v27 = vpop.permute.xlu1 %73  }
  0x89   :  { %70 = vst.msk [vmem:[#allocation0] sm:$0x1] %vm69_vm11, %v68_v26  }
  0x8a   :  { %76 = vst.msk [vmem:[#allocation0] sm:$0x1] %vm75_vm12, %v74_v27  }
  0x8c   :  { %v80_v28 = vpop.permute.xlu0 %79   ;;  %v86_v29 = vpop.permute.xlu1 %85  }
  0x8d   :  { %82 = vst.msk [vmem:[#allocation0] sm:$0x1] %vm81_vm13, %v80_v28  }
  0x8e   :  { %88 = vst.msk [vmem:[#allocation0] sm:$0x1] %vm87_vm14, %v86_v29  }
  0x90   :  { %v92_v30 = vpop.permute.xlu0 %91  }
  0x91   :  { %94 = vst.msk [vmem:[#allocation0] sm:$0x1] %vm93_vm15, %v92_v30  }
  0x98   :  { %v98_v31 = vld [vmem:[#allocation0] sm:$0x1] }
  0x99   :  { %100 = vst [vmem:[%s208_s1] sm:$0x1] %v98_v31 }

// kernel: tile.29
= control target key start
LH: loop header
LB: loop body
LE: loop exit
PB: predicated region body
PF: predicated region fallthrough
CT: control target
= control target key end

     0   :  { %vm6_vm0 = vcmask 1043458   ;;  %vm10_vm1 = vcmask 1045508   ;;  %vm14_vm2 = vcmask 1047558   ;;  %s19_s6 = smov 3  ;;  %s22_s7 = smov 12  ;;  %vm16_vm3 = vcmask 64512   ;;  %s736_s0 = inlined_call_operand.vmem [shape: f32[16,8,8], index: 0, kind: input, shape index: {}]   ;;  %s737_s1 = inlined_call_operand.vmem [shape: f32[128,8], index: 1, kind: output, shape index: {}]  }
   0x1   :  { %v348_v0 = vld [vmem:[%s736_s0 + $0xf] ss:$16 sm:%s19_s6]   ;;  %s27_s12 = smov 48  ;;  %s32_s13 = smov 192  ;;  %vm38_vm4 = vcmask 1048512   ;;  %vm60_vm5 = vcmask 982912  }
   0x2   :  { %v349_v1 = vld [vmem:[%s736_s0 + $0xf] ss:$16 sm:%s22_s7]   ;;  %s63_s18 = smov 3  ;;  %s66_s21 = smov 12  ;;  %vm82_vm6 = vcmask 917312   ;;  %vm104_vm7 = vcmask 851712  }
   0x3   :  { %v25_v2 = vsel %vm6_vm0, %v349_v1, %v348_v0  ;;  %v350_v3 = vld [vmem:[%s736_s0 + $0xf] ss:$16 sm:%s27_s12]   ;;  %v356_v6 = vld [vmem:[%s736_s0 + $0xd] ss:$16 sm:%s63_s18]   ;;  %s71_s22 = smov 48  ;;  %s76_s27 = smov 192 }
   0x4   :  { %v351_v4 = vld [vmem:[%s736_s0 + $0xf] ss:$16 sm:%s32_s13]   ;;  %v30_v5 = vsel %vm10_vm1, %v350_v3, %v25_v2  ;;  %v357_v8 = vld [vmem:[%s736_s0 + $0xd] ss:$16 sm:%s66_s21]   ;;  %s423_s28 = smov 120   ;;  %s41_s2 = smov 3 }
   0x5   :  { %v35_v7 = vsel %vm14_vm2, %v351_v4, %v30_v5  ;;  %v358_v9 = vld [vmem:[%s736_s0 + $0xd] ss:$16 sm:%s71_s22]   ;;  %v69_v10 = vsel %vm6_vm0, %v357_v8, %v356_v6  ;;  %s44_s3 = smov 12  ;;  %v352_v13 = vld [vmem:[%s736_s0 + $0xe] ss:$16 sm:%s41_s2]   ;;  %s49_s8 = smov 48 }
   0x6   :  { %36 = vrot.lane.b32.xlu0 %v35_v7, %s423_s28  ;;  %v359_v11 = vld [vmem:[%s736_s0 + $0xd] ss:$16 sm:%s76_s27]   ;;  %v74_v12 = vsel %vm10_vm1, %v358_v9, %v69_v10  ;;  %s54_s9 = smov 192  ;;  %s85_s14 = smov 3  ;;  %vm126_vm8 = vcmask 786112   ;;  %vm148_vm9 = vcmask 720512  }
   0x7   :  { %v353_v14 = vld [vmem:[%s736_s0 + $0xe] ss:$16 sm:%s44_s3]   ;;  %v79_v15 = vsel %vm14_vm2, %v359_v11, %v74_v12  ;;  %s424_s15 = smov 104   ;;  %v360_v20 = vld [vmem:[%s736_s0 + $0xc] ss:$16 sm:%s85_s14]   ;;  %s88_s18 = smov 12 }
   0x8   :  { %v47_v16 = vsel %vm6_vm0, %v353_v14, %v352_v13  ;;  %v354_v17 = vld [vmem:[%s736_s0 + $0xe] ss:$16 sm:%s49_s8]   ;;  %80 = vrot.lane.b32.xlu1 %v79_v15, %s424_s15  ;;  %s93_s19 = smov 48  ;;  %s98_s24 = smov 192  ;;  %vm170_vm10 = vcmask 654912   ;;  %vm192_vm11 = vcmask 589312  }
   0x9   :  { %v355_v18 = vld [vmem:[%s736_s0 + $0xe] ss:$16 sm:%s54_s9]   ;;  %v52_v19 = vsel %vm10_vm1, %v354_v17, %v47_v16  ;;  %v361_v22 = vld [vmem:[%s736_s0 + $0xc] ss:$16 sm:%s88_s18]   ;;  %s425_s25 = smov 112   ;;  %s107_s28 = smov 3 }
   0xa   :  { %v57_v21 = vsel %vm14_vm2, %v355_v18, %v52_v19  ;;  %v362_v23 = vld [vmem:[%s736_s0 + $0xc] ss:$16 sm:%s93_s19]   ;;  %v91_v24 = vsel %vm6_vm0, %v361_v22, %v360_v20  ;;  %s110_s29 = smov 12  ;;  %v364_v27 = vld [vmem:[%s736_s0 + $0xb] ss:$16 sm:%s107_s28]   ;;  %s115_s5 = smov 48 }
   0xb   :  { %58 = vrot.lane.b32.xlu0 %v57_v21, %s425_s25  ;;  %v363_v25 = vld [vmem:[%s736_s0 + $0xc] ss:$16 sm:%s98_s24]   ;;  %v96_v26 = vsel %vm10_vm1, %v362_v23, %v91_v24  ;;  %s120_s6 = smov 192  ;;  %s129_s11 = smov 3  ;;  %vm214_vm12 = vcmask 523712   ;;  %vm236_vm13 = vcmask 458112  }
   0xc   :  { %v365_v28 = vld [vmem:[%s736_s0 + $0xb] ss:$16 sm:%s110_s29]   ;;  %v101_v29 = vsel %vm14_vm2, %v363_v25, %v96_v26  ;;  %s426_s12 = smov 96   ;;  %v368_v34 = vld [vmem:[%s736_s0 + $0xa] ss:$16 sm:%s129_s11]   ;;  %s132_s15 = smov 12 }
   0xd   :  { %v113_v30 = vsel %vm6_vm0, %v365_v28, %v364_v27  ;;  %v366_v31 = vld [vmem:[%s736_s0 + $0xb] ss:$16 sm:%s115_s5]   ;;  %102 = vrot.lane.b32.xlu1 %v101_v29, %s426_s12  ;;  %s137_s16 = smov 48  ;;  %s142_s21 = smov 192  ;;  %vm258_vm14 = vcmask 392512   ;;  %vm280_vm15 = vcmask 326912  }
   0xe   :  { %v367_v32 = vld [vmem:[%s736_s0 + $0xb] ss:$16 sm:%s120_s6]   ;;  %v118_v33 = vsel %vm10_vm1, %v366_v31, %v113_v30  ;;  %v369_v36 = vld [vmem:[%s736_s0 + $0xa] ss:$16 sm:%s132_s15]   ;;  %s427_s22 = smov 88   ;;  %s151_s25 = smov 3 }
   0xf   :  { %v123_v35 = vsel %vm14_vm2, %v367_v32, %v118_v33  ;;  %v370_v37 = vld [vmem:[%s736_s0 + $0xa] ss:$16 sm:%s137_s16]   ;;  %v135_v38 = vsel %vm6_vm0, %v369_v36, %v368_v34  ;;  %s154_s26 = smov 12  ;;  %v372_v41 = vld [vmem:[%s736_s0 + $0x9] ss:$16 sm:%s151_s25]   ;;  %s159_s2 = smov 48 }
  0x10   :  { %124 = vrot.lane.b32.xlu0 %v123_v35, %s427_s22  ;;  %v371_v39 = vld [vmem:[%s736_s0 + $0xa] ss:$16 sm:%s142_s21]   ;;  %v140_v40 = vsel %vm10_vm1, %v370_v37, %v135_v38  ;;  %s164_s3 = smov 192  ;;  %s173_s8 = smov 3 }
  0x11   :  { %v373_v42 = vld [vmem:[%s736_s0 + $0x9] ss:$16 sm:%s154_s26]   ;;  %v145_v43 = vsel %vm14_vm2, %v371_v39, %v140_v40  ;;  %s428_s9 = smov 80   ;;  %v376_v48 = vld [vmem:[%s736_s0 + $0x8] ss:$16 sm:%s173_s8]   ;;  %s176_s12 = smov 12 }
  0x12   :  { %v157_v44 = vsel %vm6_vm0, %v373_v42, %v372_v41  ;;  %v374_v45 = vld [vmem:[%s736_s0 + $0x9] ss:$16 sm:%s159_s2]   ;;  %146 = vrot.lane.b32.xlu1 %v145_v43, %s428_s9  ;;  %s181_s13 = smov 48  ;;  %s186_s18 = smov 192 }
  0x13   :  { %v375_v46 = vld [vmem:[%s736_s0 + $0x9] ss:$16 sm:%s164_s3]   ;;  %v162_v47 = vsel %vm10_vm1, %v374_v45, %v157_v44  ;;  %v377_v50 = vld [vmem:[%s736_s0 + $0x8] ss:$16 sm:%s176_s12]   ;;  %s429_s19 = smov 72   ;;  %s195_s22 = smov 3 }
  0x14   :  { %v167_v49 = vsel %vm14_vm2, %v375_v46, %v162_v47  ;;  %v378_v51 = vld [vmem:[%s736_s0 + $0x8] ss:$16 sm:%s181_s13]   ;;  %v179_v52 = vsel %vm6_vm0, %v377_v50, %v376_v48  ;;  %s198_s23 = smov 12  ;;  %v380_v55 = vld [vmem:[%s736_s0 + $0x7] ss:$16 sm:%s195_s22]   ;;  %s203_s28 = smov 48 }
  0x15   :  { %168 = vrot.lane.b32.xlu0 %v167_v49, %s429_s19  ;;  %v379_v53 = vld [vmem:[%s736_s0 + $0x8] ss:$16 sm:%s186_s18]   ;;  %v184_v54 = vsel %vm10_vm1, %v378_v51, %v179_v52  ;;  %s208_s29 = smov 192  ;;  %s217_s5 = smov 3 }
  0x16   :  { %v381_v56 = vld [vmem:[%s736_s0 + $0x7] ss:$16 sm:%s198_s23]   ;;  %v189_v57 = vsel %vm14_vm2, %v379_v53, %v184_v54  ;;  %s430_s6 = smov 64   ;;  %v384_v62 = vld [vmem:[%s736_s0 + $0x6] ss:$16 sm:%s217_s5]   ;;  %s220_s9 = smov 12 }
  0x17   :  { %v201_v58 = vsel %vm6_vm0, %v381_v56, %v380_v55  ;;  %v382_v59 = vld [vmem:[%s736_s0 + $0x7] ss:$16 sm:%s203_s28]   ;;  %190 = vrot.lane.b32.xlu1 %v189_v57, %s430_s6  ;;  %s225_s10 = smov 48  ;;  %s230_s15 = smov 192 }
  0x18   :  { %v383_v60 = vld [vmem:[%s736_s0 + $0x7] ss:$16 sm:%s208_s29]   ;;  %v206_v61 = vsel %vm10_vm1, %v382_v59, %v201_v58  ;;  %v385_v0 = vld [vmem:[%s736_s0 + $0x6] ss:$16 sm:%s220_s9]   ;;  %s431_s16 = smov 56   ;;  %s239_s19 = smov 3 }
  0x19   :  { %v211_v63 = vsel %vm14_vm2, %v383_v60, %v206_v61  ;;  %v386_v1 = vld [vmem:[%s736_s0 + $0x6] ss:$16 sm:%s225_s10]   ;;  %v223_v2 = vsel %vm6_vm0, %v385_v0, %v384_v62  ;;  %s242_s20 = smov 12  ;;  %v388_v5 = vld [vmem:[%s736_s0 + $0x5] ss:$16 sm:%s239_s19]   ;;  %s247_s25 = smov 48 }
  0x1a   :  { %212 = vrot.lane.b32.xlu0 %v211_v63, %s431_s16  ;;  %v387_v3 = vld [vmem:[%s736_s0 + $0x6] ss:$16 sm:%s230_s15]   ;;  %v228_v4 = vsel %vm10_vm1, %v386_v1, %v223_v2  ;;  %s252_s26 = smov 192  ;;  %s261_s2 = smov 3 }
  0x1b   :  { %v389_v6 = vld [vmem:[%s736_s0 + $0x5] ss:$16 sm:%s242_s20]   ;;  %v233_v7 = vsel %vm14_vm2, %v387_v3, %v228_v4  ;;  %s432_s3 = smov 48   ;;  %v392_v12 = vld [vmem:[%s736_s0 + $0x4] ss:$16 sm:%s261_s2]   ;;  %s264_s6 = smov 12 }
  0x1c   :  { %v245_v8 = vsel %vm6_vm0, %v389_v6, %v388_v5  ;;  %v390_v9 = vld [vmem:[%s736_s0 + $0x5] ss:$16 sm:%s247_s25]   ;;  %234 = vrot.lane.b32.xlu1 %v233_v7, %s432_s3  ;;  %s269_s7 = smov 48  ;;  %s274_s12 = smov 192 }
  0x1d   :  { %v391_v10 = vld [vmem:[%s736_s0 + $0x5] ss:$16 sm:%s252_s26]   ;;  %v250_v11 = vsel %vm10_vm1, %v390_v9, %v245_v8  ;;  %v393_v14 = vld [vmem:[%s736_s0 + $0x4] ss:$16 sm:%s264_s6]   ;;  %s433_s13 = smov 40   ;;  %s283_s16 = smov 3 }
  0x1e   :  { %v255_v13 = vsel %vm14_vm2, %v391_v10, %v250_v11  ;;  %v394_v15 = vld [vmem:[%s736_s0 + $0x4] ss:$16 sm:%s269_s7]   ;;  %v267_v16 = vsel %vm6_vm0, %v393_v14, %v392_v12  ;;  %s286_s17 = smov 12  ;;  %v396_v19 = vld [vmem:[%s736_s0 + $0x3] ss:$16 sm:%s283_s16]   ;;  %s291_s22 = smov 48 }
  0x1f   :  { %256 = vrot.lane.b32.xlu0 %v255_v13, %s433_s13  ;;  %v395_v17 = vld [vmem:[%s736_s0 + $0x4] ss:$16 sm:%s274_s12]   ;;  %v272_v18 = vsel %vm10_vm1, %v394_v15, %v267_v16  ;;  %s296_s23 = smov 192  ;;  %s305_s28 = smov 3 }
  0x20   :  { %v397_v20 = vld [vmem:[%s736_s0 + $0x3] ss:$16 sm:%s286_s17]   ;;  %v277_v21 = vsel %vm14_vm2, %v395_v17, %v272_v18  ;;  %s434_s29 = smov 32   ;;  %v400_v26 = vld [vmem:[%s736_s0 + $0x2] ss:$16 sm:%s305_s28]   ;;  %s308_s3 = smov 12 }
  0x21   :  { %v289_v22 = vsel %vm6_vm0, %v397_v20, %v396_v19  ;;  %v398_v23 = vld [vmem:[%s736_s0 + $0x3] ss:$16 sm:%s291_s22]   ;;  %278 = vrot.lane.b32.xlu1 %v277_v21, %s434_s29  ;;  %s313_s4 = smov 48  ;;  %s318_s9 = smov 192 }
  0x22   :  { %v399_v24 = vld [vmem:[%s736_s0 + $0x3] ss:$16 sm:%s296_s23]   ;;  %v294_v25 = vsel %vm10_vm1, %v398_v23, %v289_v22  ;;  %v401_v28 = vld [vmem:[%s736_s0 + $0x2] ss:$16 sm:%s308_s3]   ;;  %s435_s10 = smov 24   ;;  %s327_s13 = smov 3 }
  0x23   :  { %v299_v27 = vsel %vm14_vm2, %v399_v24, %v294_v25  ;;  %v402_v29 = vld [vmem:[%s736_s0 + $0x2] ss:$16 sm:%s313_s4]   ;;  %v311_v30 = vsel %vm6_vm0, %v401_v28, %v400_v26  ;;  %s330_s14 = smov 12  ;;  %v404_v33 = vld [vmem:[%s736_s0 + $0x1] ss:$16 sm:%s327_s13]   ;;  %s335_s19 = smov 48 }
  0x24   :  { %300 = vrot.lane.b32.xlu0 %v299_v27, %s435_s10  ;;  %v403_v31 = vld [vmem:[%s736_s0 + $0x2] ss:$16 sm:%s318_s9]   ;;  %v316_v32 = vsel %vm10_vm1, %v402_v29, %v311_v30  ;;  %s340_s20 = smov 192  ;;  %s2_s25 = smov 3 }
  0x25   :  { %v405_v34 = vld [vmem:[%s736_s0 + $0x1] ss:$16 sm:%s330_s14]   ;;  %v321_v35 = vsel %vm14_vm2, %v403_v31, %v316_v32  ;;  %s436_s26 = smov 16   ;;  %s4_s27 = smov 12  ;;  %v3_v40 = vld [vmem:[%s736_s0] ss:$16 sm:%s2_s25]  }
  0x26   :  { %v333_v36 = vsel %vm6_vm0, %v405_v34, %v404_v33  ;;  %v406_v37 = vld [vmem:[%s736_s0 + $0x1] ss:$16 sm:%s335_s19]   ;;  %322 = vrot.lane.b32.xlu1 %v321_v35, %s436_s26  ;;  %s8_s28 = smov 48  ;;  %s12_s2 = smov 192 }
  0x27   :  { %v407_v38 = vld [vmem:[%s736_s0 + $0x1] ss:$16 sm:%s340_s20]   ;;  %v338_v39 = vsel %vm10_vm1, %v406_v37, %v333_v36  ;;  %v5_v42 = vld [vmem:[%s736_s0] ss:$16 sm:%s4_s27]   ;;  %s437_s7 = smov 8  }
  0x28   :  { %v343_v41 = vsel %vm14_vm2, %v407_v38, %v338_v39  ;;  %v9_v43 = vld [vmem:[%s736_s0] ss:$16 sm:%s8_s28]   ;;  %v7_v44 = vsel %vm6_vm0, %v5_v42, %v3_v40  ;;  %vm302_vm0 = vcmask 261312  }
  0x29   :  { %344 = vrot.lane.b32.xlu0 %v343_v41, %s437_s7  ;;  %v13_v45 = vld [vmem:[%s736_s0] ss:$16 sm:%s12_s2]   ;;  %v11_v46 = vsel %vm10_vm1, %v9_v43, %v7_v44  ;;  %vm324_vm1 = vcmask 195712  }
  0x2a   :  { %v15_v47 = vsel %vm14_vm2, %v13_v45, %v11_v46  ;;  %vm346_vm2 = vcmask 130112  }
  0x2b   :  { %17 = vst.msk [vmem:[%s737_s1] sm:$0xff] %vm16_vm3, %v15_v47  }
  0x78   :  { %v37_v48 = vpop.permute.xlu0 %36  }
  0x79   :  { %39 = vst.msk [vmem:[%s737_s1] sm:$0xff] %vm38_vm4, %v37_v48  }
  0x7a   :  { %v81_v49 = vpop.permute.xlu1 %80  }
  0x7d   :  { %v59_v50 = vpop.permute.xlu0 %58  }
  0x7e   :  { %61 = vst.msk [vmem:[%s737_s1] sm:$0xff] %vm60_vm5, %v59_v50  }
  0x7f   :  { %83 = vst.msk [vmem:[%s737_s1] sm:$0xff] %vm82_vm6, %v81_v49   ;;  %v103_v51 = vpop.permute.xlu1 %102  }
  0x80   :  { %105 = vst.msk [vmem:[%s737_s1] sm:$0xff] %vm104_vm7, %v103_v51  }
  0x82   :  { %v125_v52 = vpop.permute.xlu0 %124  }
  0x83   :  { %127 = vst.msk [vmem:[%s737_s1] sm:$0xff] %vm126_vm8, %v125_v52  }
  0x84   :  { %v147_v53 = vpop.permute.xlu1 %146  }
  0x85   :  { %149 = vst.msk [vmem:[%s737_s1] sm:$0xff] %vm148_vm9, %v147_v53  }
  0x87   :  { %v169_v54 = vpop.permute.xlu0 %168  }
  0x88   :  { %171 = vst.msk [vmem:[%s737_s1] sm:$0xff] %vm170_vm10, %v169_v54  }
  0x89   :  { %v191_v55 = vpop.permute.xlu1 %190  }
  0x8a   :  { %193 = vst.msk [vmem:[%s737_s1] sm:$0xff] %vm192_vm11, %v191_v55  }
  0x8c   :  { %v213_v56 = vpop.permute.xlu0 %212  }
  0x8d   :  { %215 = vst.msk [vmem:[%s737_s1] sm:$0xff] %vm214_vm12, %v213_v56  }
  0x8e   :  { %v235_v57 = vpop.permute.xlu1 %234  }
  0x8f   :  { %237 = vst.msk [vmem:[%s737_s1] sm:$0xff] %vm236_vm13, %v235_v57  }
  0x91   :  { %v257_v58 = vpop.permute.xlu0 %256  }
  0x92   :  { %259 = vst.msk [vmem:[%s737_s1] sm:$0xff] %vm258_vm14, %v257_v58  }
  0x93   :  { %v279_v59 = vpop.permute.xlu1 %278  }
  0x94   :  { %281 = vst.msk [vmem:[%s737_s1] sm:$0xff] %vm280_vm15, %v279_v59  }
  0x96   :  { %v301_v60 = vpop.permute.xlu0 %300  }
  0x97   :  { %303 = vst.msk [vmem:[%s737_s1] sm:$0xff] %vm302_vm0, %v301_v60  }
  0x98   :  { %v323_v61 = vpop.permute.xlu1 %322  }
  0x99   :  { %325 = vst.msk [vmem:[%s737_s1] sm:$0xff] %vm324_vm1, %v323_v61  }
  0x9b   :  { %v345_v62 = vpop.permute.xlu0 %344  }
  0x9c   :  { %347 = vst.msk [vmem:[%s737_s1] sm:$0xff] %vm346_vm2, %v345_v62  }

// kernel: encoder_forward.1
= control target key start
LH: loop header
LB: loop body
LE: loop exit
PB: predicated region body
PF: predicated region fallthrough
CT: control target
= control target key end

     0   :  { %v50_v0 = vlaneseq  ;;  %vm202_vm0 = vcmask 523264   ;;  %v1715_v58 = vmov 0.0|0.0   ;;  %vm1716_vm7 = vmmov 0   ;;  %s2142_s3 = inlined_call_operand.vmem [shape: bf16[3,64,128], index: 3, kind: input, shape index: {}]   ;;  %s2143_s0 = inlined_call_operand.vmem [shape: f32[32,64], index: 0, kind: input, shape index: {}]   ;;  %s2144_s1 = inlined_call_operand.vmem [shape: f32[128,8], index: 1, kind: input, shape index: {}]   ;;  %s2145_s2 = inlined_call_operand.vmem [shape: f32[8,128], index: 2, kind: input, shape index: {}]   ;;  %s2146_s6 = inlined_call_operand.vmem [shape: bf16[3,128,128], index: 6, kind: input, shape index: {}]   ;;  %s2147_s4 = inlined_call_operand.vmem [shape: f32[1,128], index: 4, kind: input, shape index: {}]   ;;  %s2148_s5 = inlined_call_operand.vmem [shape: f32[1,128], index: 5, kind: input, shape index: {}]   ;;  %s2149_s7 = inlined_call_operand.vmem [shape: f32[1,128], index: 7, kind: input, shape index: {}]   ;;  %s2150_s8 = inlined_call_operand.vmem [shape: f32[1,128], index: 8, kind: input, shape index: {}]   ;;  %s2151_s9 = inlined_call_operand.vmem [shape: f32[32,128], index: 9, kind: output, shape index: {}]  }
   0x1   :  { %v1675_v1 = vld [vmem:[%s2142_s3 + $0x20] sm:$0xff]   ;;  %v1676_v2 = vld [vmem:[%s2142_s3 + $0x28] sm:$0xff]   ;;  %v1677_v4 = vld [vmem:[%s2142_s3 + $0x30] sm:$0xff]   ;;  %vm453_vm8 = vcmask 1040384   ;;  %vm535_vm9 = vcmask 64512   ;;  %vm1718_vm10 = vmmov 1  }
   0x2   :  { %v1775_v3 = vshrl.u32 %v50_v0, 7  ;;  %1431 = vmatprep.subr.bf16.mxu0 %v1675_v1  ;;  %v1783_v5 = vld [vmem:[%s2143_s0] sm:$0xff]  ;;  %v112_v6 = vld [vmem:[%s2143_s0 + $0x8] sm:$0xff]  ;;  %v1794_v10 = vld [vmem:[%s2143_s0 + $0x18] sm:$0xff] }
   0x3   :  { %1432 = vmatpush3.bf16.msra.mxu0 %v1675_v1  ;;  %v115_v7 = vrot.slane %v1783_v5, 7  ;;  %v167_v9 = vpack.c.bf16 %v112_v6, %v1783_v5  ;;  %v118_v11 = vrot.slane %v1794_v10, 7  ;;  %v1678_v12 = vld [vmem:[%s2142_s3 + $0x38] sm:$0xff]   ;;  %v116_v13 = vrot.slane %v112_v6, 7  ;;  %v113_v16 = vld [vmem:[%s2143_s0 + $0x10] sm:$0xff]  ;;  %v1679_v17 = vld [vmem:[%s2142_s3] sm:$0xff]  }
   0x4   :  { %1433 = vmatprep.subr.bf16.mxu0 %v1676_v2  ;;  %v59_v8 = vand.u32 15, %v1775_v3  ;;  %vm119_vm1 = vcmp.lt.s32.totalorder %v1775_v3, 1  ;;  %v168_v20 = vpack.c.bf16 %v1794_v10, %v113_v16  ;;  %v1680_v22 = vld [vmem:[%s2142_s3 + $0x8] sm:$0xff]   ;;  %v53_v23 = vadd.s32 16, %v1775_v3  ;;  %v1681_v26 = vld [vmem:[%s2142_s3 + $0x10] sm:$0xff]   ;;  %v1682_v32 = vld [vmem:[%s2142_s3 + $0x18] sm:$0xff]  }
   0x5   :  { %1439 = vmatprep.mubr.msk.bf16.mxu0 %vm202_vm0, %v167_v9  ;;  %v123_v15 = vsel %vm119_vm1, %v118_v11, %v115_v7  ;;  %v122_v18 = vsel %vm119_vm1, %v115_v7, %v116_v13  ;;  %v52_v24 = vadd.s32 8, %v1775_v3  ;;  %v117_v25 = vrot.slane %v113_v16, 7  ;;  %v1683_v39 = vld [vmem:[%s2142_s3 + $0x40] sm:$0xff]   ;;  %v1684_v44 = vld [vmem:[%s2142_s3 + $0x48] sm:$0xff]   ;;  %v1685_v47 = vld [vmem:[%s2142_s3 + $0x50] sm:$0xff]  }
   0x6   :  { %vm1802_vm2 = vcmp.ge.s32.totalorder %v59_v8, 1  ;;  %v73_v27 = vand.u32 15, %v53_v23  ;;  %v137_v28 = vrot.slane %v112_v6, 1  ;;  %v138_v29 = vrot.slane %v113_v16, 1  ;;  %v1686_v49 = vld [vmem:[%s2142_s3 + $0x58] sm:$0xff]   ;;  %v33_v54 = vld [vmem:[%s2144_s1] sm:$0xff] }
   0x7   :  { %1434 = vmatpush3.bf16.msra.mxu0 %v1676_v2  ;;  %v132_v19 = vsel %vm1802_vm2, %v123_v15, 0.0  ;;  %v66_v30 = vand.u32 15, %v52_v24  ;;  %vm140_vm3 = vcmp.lt.s32.totalorder %v1775_v3, 7  ;;  %v136_v31 = vrot.slane %v1783_v5, 1  ;;  %v34_v55 = vld [vmem:[%s2144_s1 + $0x8] sm:$0xff]  ;;  %v35_v59 = vld [vmem:[%s2144_s1 + $0x10] sm:$0xff]  ;;  %vm1307_vm11 = vmpackc.low %vm1718_vm10, %vm1802_vm2 }
   0x8   :  { %1435 = vmatprep.subr.bf16.mxu0 %v1677_v4  ;;  %v157_v21 = vpack.c.bf16 %v122_v18, %v132_v19  ;;  %vm1834_vm4 = vcmp.ge.s32.totalorder %v73_v27, 1  ;;  %v121_v34 = vsel %vm119_vm1, %v116_v13, %v117_v25  ;;  %v142_v36 = vsel %vm140_vm3, %v137_v28, %v138_v29  ;;  %v36_v60 = vld [vmem:[%s2144_s1 + $0x18] sm:$0xff]  ;;  %v37_v62 = vld [vmem:[%s2144_s1 + $0x20] sm:$0xff]  ;;  %v38_v63 = vld [vmem:[%s2144_s1 + $0x28] sm:$0xff] }
   0x9   :  { %vm1840_vm5 = vcmp.le.s32.totalorder %v66_v30, 14  ;;  %v120_v37 = vsel %vm119_vm1, %v117_v25, %v118_v11  ;;  %v134_v38 = vsel %vm1834_vm4, %v121_v34, 0.0  ;;  %v143_v40 = vsel %vm140_vm3, %v136_v31, %v137_v28  ;;  %v39_v1 = vld [vmem:[%s2144_s1 + $0x30] sm:$0xff]  ;;  %v40_v2 = vld [vmem:[%s2144_s1 + $0x38] sm:$0xff]  ;;  %v41_v5 = vld [vmem:[%s2144_s1 + $0x40] sm:$0xff] }
   0xa   :  { %v154_v41 = vsel %vm1840_vm5, %v142_v36, 0.0  ;;  %v158_v42 = vpack.c.bf16 %v120_v37, %v134_v38  ;;  %v54_v45 = vadd.s32 24, %v1775_v3  ;;  %v139_v46 = vrot.slane %v1794_v10, 1  ;;  %v42_v6 = vld [vmem:[%s2144_s1 + $0x48] sm:$0xff]  ;;  %v43_v8 = vld [vmem:[%s2144_s1 + $0x50] sm:$0xff]  ;;  %v44_v9 = vld [vmem:[%s2144_s1 + $0x58] sm:$0xff] }
   0xb   :  { %1436 = vmatpush3.bf16.msra.mxu0 %v1677_v4  ;;  %v337_v43 = vpack.c.bf16 %v154_v41, %v143_v40  ;;  %v1886_v57 = vpack.c.bf16 %v34_v55, %v33_v54  ;;  %v1897_v61 = vpack.c.bf16 %v36_v60, %v35_v59  ;;  %v1908_v0 = vpack.c.bf16 %v38_v63, %v37_v62  ;;  %v45_v11 = vld [vmem:[%s2144_s1 + $0x60] sm:$0xff]  ;;  %v47_v15 = vld [vmem:[%s2144_s1 + $0x70] sm:$0xff]  ;;  %v48_v16 = vld [vmem:[%s2144_s1 + $0x78] sm:$0xff] }
   0xc   :  { %1437 = vmatprep.subr.bf16.mxu0 %v1678_v12  ;;  %v80_v48 = vand.u32 15, %v54_v45  ;;  %v144_v51 = vsel %vm140_vm3, %v139_v46, %v136_v31  ;;  %v141_v52 = vsel %vm140_vm3, %v138_v29, %v139_v46  ;;  %v1918_v4 = vpack.c.bf16 %v40_v2, %v39_v1  ;;  %v1688_v59 = vld [vmem:[%s2146_s6 + $0x48] sm:$0xff]   ;;  %v1690_v62 = vld [vmem:[%s2146_s6 + $0x58] sm:$0xff]   ;;  %v1691_v63 = vld [vmem:[%s2146_s6 + $0x60] sm:$0xff]  }
   0xd   :  { %v1620_v7 = vpack.c.bf16 %v42_v6, %v41_v5  ;;  %v1623_v10 = vpack.c.bf16 %v44_v9, %v43_v8  ;;  %v1629_v18 = vpack.c.bf16 %v48_v16, %v47_v15  ;;  %v1693_v1 = vld [vmem:[%s2146_s6 + $0x70] sm:$0xff]   ;;  %v1694_v2 = vld [vmem:[%s2146_s6 + $0x78] sm:$0xff]   ;;  %v1274_v5 = vld [vmem:[%s2147_s4] ss:$0 sm:$0xff]  ;;  %v625_v6 = vsub.s32 1, %v1775_v3 }
   0xe   :  { %vm1870_vm6 = vcmp.le.s32.totalorder %v80_v48, 14  ;;  %v1992_v48 = vld [vmem:[%s2145_s2] sm:$0xff]  ;;  %v1697_v14 = vld [vmem:[%s2146_s6 + $0x10] sm:$0xff]   ;;  %vm1310_vm12 = vmpackc.low %vm1718_vm10, %vm1834_vm4 }
   0xf   :  { %1438 = vmatpush3.bf16.msra.mxu0 %v1678_v12  ;;  %v156_v53 = vsel %vm1870_vm6, %v144_v51, 0.0  ;;  %v46_v12 = vld [vmem:[%s2144_s1 + $0x68] sm:$0xff]  ;;  %vm1337_vm13 = vmpackc.low %vm1840_vm5, %vm1718_vm10  ;;  %v1706_v33 = vld [vmem:[%s2146_s6 + $0x98] sm:$0xff]  }
  0x10   :  { %1443 = vmatprep.subr.bf16.mxu0 %v1679_v17  ;;  %v338_v56 = vpack.c.bf16 %v156_v53, %v141_v52  ;;  %v1626_v13 = vpack.c.bf16 %v46_v12, %v45_v11  ;;  %v617_v12 = vld [vmem:[%s2148_s5] sm:$0x1]  ;;  %vm1340_vm14 = vmpackc.low %vm1870_vm6, %vm1718_vm10 }
  0x11   :  { %v1707_v35 = vld [vmem:[%s2146_s6 + $0xa0] sm:$0xff]  }
  0x12   :  { %1440 = vmatmul.mubr.msk.bf16.vlgmr.msra.gmra.mrb[0].mxu0 %vm202_vm0, %v168_v20 }
  0x13   :  { %1444 = vmatpush3.bf16.msra.mxu0 %v1679_v17  ;;  %1451 = vmatprep.mubr.msk.bf16.mxu0 %vm202_vm0, %v157_v21  ;;  %v1717_v17 = vmov 0.0  }
  0x14   :  { %1445 = vmatprep.subr.bf16.mxu0 %v1680_v22  ;;  %1502 = vmatprep.subr.mxu1 %v1717_v17 }
  0x15   :  { %1504 = vmatprep.mubr.msk.f32.mxu1 %vm1716_vm7, %v1717_v17  ;;  %1503 = vmatpush3.msra.mxu1 %v1992_v48 }
  0x17   :  { %1446 = vmatpush3.bf16.msra.mxu0 %v1680_v22 }
  0x18   :  { %1447 = vmatprep.subr.bf16.mxu0 %v1681_v26 }
  0x1b   :  { %1448 = vmatpush3.bf16.msra.mxu0 %v1681_v26 }
  0x1c   :  { %1449 = vmatprep.subr.bf16.mxu0 %v1682_v32 }
  0x1f   :  { %1450 = vmatpush3.bf16.msra.mxu0 %v1682_v32 }
  0x20   :  { %1455 = vmatprep.subr.bf16.mxu0 %v1683_v39 }
  0x22   :  { %1452 = vmatmul.mubr.msk.bf16.vlgmr.msra.gmra.mrb[0].mxu0 %vm202_vm0, %v158_v42 }
  0x23   :  { %1456 = vmatpush3.bf16.msra.mxu0 %v1683_v39  ;;  %1463 = vmatprep.mubr.msk.bf16.mxu0 %vm202_vm0, %v337_v43 }
  0x24   :  { %1457 = vmatprep.subr.bf16.mxu0 %v1684_v44 }
  0x27   :  { %1458 = vmatpush3.bf16.msra.mxu0 %v1684_v44 }
  0x28   :  { %1459 = vmatprep.subr.bf16.mxu0 %v1685_v47 }
  0x2b   :  { %1460 = vmatpush3.bf16.msra.mxu0 %v1685_v47 }
  0x2c   :  { %1461 = vmatprep.subr.bf16.mxu0 %v1686_v49 }
  0x2f   :  { %1462 = vmatpush3.bf16.msra.mxu0 %v1686_v49  ;;  %v1687_v49 = vld [vmem:[%s2146_s6 + $0x40] sm:$0xff]  }
  0x30   :  { %1607 = vmatprep.subr.bf16.mxu0 %v1715_v58  ;;  %1507 = vmatprep.subr.bf16.mxu1 %v1687_v49 }
  0x32   :  { %1464 = vmatmul.mubr.msk.bf16.vlgmr.msra.gmra.mrb[0].mxu0 %vm202_vm0, %v338_v56 }
  0x33   :  { %1609 = vmatpush3.bf16.msra.mxu0 %v1886_v57  ;;  %1499 = vmatprep.mubr.msk.f32.mxu0 %vm1716_vm7, %v1717_v17 }
  0x34   :  { %1610 = vmatprep.subr.bf16.mxu0 %v1715_v58 }
  0x37   :  { %1612 = vmatpush3.bf16.msra.mxu0 %v1897_v61 }
  0x38   :  { %1613 = vmatprep.subr.bf16.mxu0 %v1715_v58 }
  0x3b   :  { %1615 = vmatpush3.bf16.msra.mxu0 %v1908_v0 }
  0x3c   :  { %1616 = vmatprep.subr.bf16.mxu0 %v1715_v58 }
  0x3f   :  { %1618 = vmatpush3.bf16.msra.mxu0 %v1918_v4 }
  0x40   :  { %1619 = vmatprep.subr.bf16.mxu0 %v1715_v58 }
  0x43   :  { %1621 = vmatpush3.bf16.msra.mxu0 %v1620_v7 }
  0x44   :  { %1622 = vmatprep.subr.bf16.mxu0 %v1715_v58 }
  0x47   :  { %1624 = vmatpush3.bf16.msra.mxu0 %v1623_v10 }
  0x48   :  { %1625 = vmatprep.subr.bf16.mxu0 %v1715_v58 }
  0x4b   :  { %1627 = vmatpush3.bf16.msra.mxu0 %v1626_v13 }
  0x4c   :  { %1628 = vmatprep.subr.bf16.mxu0 %v1715_v58 }
  0x4f   :  { %1630 = vmatpush3.bf16.msra.mxu0 %v1629_v18 }
  0x50   :  { %1631 = vmatprep.subr.bf16.mxu0 %v1715_v58 }
 0x105   :  { %v1955_v19 = vpop.f32.mrb[0].mxu0 }
 0x106   :  { %v1957_v20 = vpop.f32.mrb[1].mxu0  ;;  %v442_v26 = vmul.f32 %v1955_v19, %v1955_v19 }
 0x107   :  { %v1959_v21 = vpop.f32.mrb[2].mxu0  ;;  %v440_v23 = vmul.f32 %v1957_v20, %v1957_v20 }
 0x108   :  { %v1961_v22 = vpop.f32.mrb[3].mxu0  ;;  %v443_v29 = vmul.f32 %v1959_v21, %v1959_v21 }
 0x109   :  { %v431_v24 = vadd.f32 %v1961_v22, %v1957_v20  ;;  %v441_v25 = vmul.f32 %v1961_v22, %v1961_v22 }
 0x10b   :  { %v432_v27 = vadd.f32 %v1955_v19, %v431_v24  ;;  %v444_v28 = vadd.f32 %v441_v25, %v440_v23 }
 0x10d   :  { %v433_v30 = vadd.f32 %v1959_v21, %v432_v27  ;;  %v445_v31 = vadd.f32 %v444_v28, %v442_v26 }
 0x10f   :  { %v434_v32 = vrot.slane %v433_v30, 4  ;;  %v446_v34 = vadd.f32 %v445_v31, %v443_v29 }
 0x111   :  { %v435_v36 = vadd.f32 %v434_v32, %v433_v30  ;;  %v447_v37 = vrot.slane %v446_v34, 4 }
 0x113   :  { %v436_v38 = vrot.slane %v435_v36, 2  ;;  %v448_v39 = vadd.f32 %v447_v37, %v446_v34 }
 0x115   :  { %v437_v40 = vadd.f32 %v436_v38, %v435_v36  ;;  %v449_v41 = vrot.slane %v448_v39, 2 }
 0x117   :  { %v438_v42 = vrot.slane %v437_v40, 1  ;;  %v450_v43 = vadd.f32 %v449_v41, %v448_v39 }
 0x119   :  { %v451_v44 = vrot.slane %v450_v43, 1  ;;  %v439_v45 = vadd.f32 %v438_v42, %v437_v40 }
 0x11b   :  { %v452_v46 = vadd.f32 %v451_v44, %v450_v43 }
 0x11d   :  { %v454_v47 = vsel %vm453_vm8, %v439_v45, %v452_v46 }
 0x11e   :  { %1500 = vmatmul.mubr.f32.vlgmr.msra.gmra.mrb[4].mxu0 %v454_v47 }
 0x11f   :  { %1633 = vmatpush3.bf16.msra.mxu0 %v1886_v57  ;;  %1599 = vmatprep.mubr.msk.f32.mxu0 %vm1716_vm7, %v1717_v17 }
 0x120   :  { %1634 = vmatprep.subr.bf16.mxu0 %v1715_v58 }
 0x123   :  { %1636 = vmatpush3.bf16.msra.mxu0 %v1897_v61  ;;  %v1689_v61 = vld [vmem:[%s2146_s6 + $0x50] sm:$0xff]  }
 0x124   :  { %1637 = vmatprep.subr.bf16.mxu0 %v1715_v58 }
 0x127   :  { %1639 = vmatpush3.bf16.msra.mxu0 %v1908_v0  ;;  %v1692_v0 = vld [vmem:[%s2146_s6 + $0x68] sm:$0xff]  }
 0x128   :  { %1640 = vmatprep.subr.bf16.mxu0 %v1715_v58 }
 0x12b   :  { %1642 = vmatpush3.bf16.msra.mxu0 %v1918_v4  ;;  %v1695_v4 = vld [vmem:[%s2146_s6] sm:$0xff]  }
 0x12c   :  { %1643 = vmatprep.subr.bf16.mxu0 %v1715_v58 }
 0x12f   :  { %1645 = vmatpush3.bf16.msra.mxu0 %v1620_v7 }
 0x130   :  { %1646 = vmatprep.subr.bf16.mxu0 %v1715_v58 }
 0x133   :  { %1648 = vmatpush3.bf16.msra.mxu0 %v1623_v10 }
 0x134   :  { %1649 = vmatprep.subr.bf16.mxu0 %v1715_v58 }
 0x137   :  { %1651 = vmatpush3.bf16.msra.mxu0 %v1626_v13  ;;  %v634_v13 = vsub.s32 0, %v1775_v3 }
 0x138   :  { %1652 = vmatprep.subr.bf16.mxu0 %v1715_v58 }
 0x13b   :  { %1654 = vmatpush3.bf16.msra.mxu0 %v1629_v18 }
 0x1f1   :  { %v521_v51 = vpop.f32.mrb[4].mxu0 }
 0x1f2   :  { %v526_v52 = vmul.f32 0.001953125, %v521_v51  ;;  %v1501_v53 = vpop.f32.mrb[5].mxu0 }
 0x1f4   :  { %v527_v54 = vmul.f32 %v526_v52, %v526_v52 }
 0x1f6   :  { %v529_v55 = vrot.slane %v527_v54, 7 }
 0x1f8   :  { %v531_v56 = vsub.f32 %v526_v52, %v529_v55 }
 0x1fa   :  { %v532_v57 = vadd.f32 1e-05, %v531_v56 }
 0x1fc   :  { %1711 = vrsqrt.f32 %v532_v57 }
 0x206   :  { %v1712_v58 = vpop.eup %1711 }
 0x207   :  { %v534_v60 = vsel %vm453_vm8, %v526_v52, %v1712_v58  ;;  %v1698_v58 = vld [vmem:[%s2146_s6 + $0x18] sm:$0xff]  }
 0x208   :  { %1505 = vmatmul.mubr.msk.f32.vlgmr.msra.gmra.mrb[0].mxu1 %vm535_vm9, %v534_v60  ;;  %v1700_v60 = vld [vmem:[%s2146_s6 + $0x28] sm:$0xff]  }
 0x209   :  { %1508 = vmatpush3.bf16.msra.mxu1 %v1687_v49 }
 0x20a   :  { %1509 = vmatprep.subr.bf16.mxu1 %v1688_v59 }
 0x20d   :  { %1510 = vmatpush3.bf16.msra.mxu1 %v1688_v59  ;;  %v1699_v59 = vld [vmem:[%s2146_s6 + $0x20] sm:$0xff]  }
 0x20e   :  { %1511 = vmatprep.subr.bf16.mxu1 %v1689_v61 }
 0x211   :  { %1512 = vmatpush3.bf16.msra.mxu1 %v1689_v61  ;;  %v1701_v61 = vld [vmem:[%s2146_s6 + $0x30] sm:$0xff]  }
 0x212   :  { %1513 = vmatprep.subr.bf16.mxu1 %v1690_v62 }
 0x215   :  { %1514 = vmatpush3.bf16.msra.mxu1 %v1690_v62  ;;  %v1702_v62 = vld [vmem:[%s2146_s6 + $0x38] sm:$0xff]  }
 0x216   :  { %1515 = vmatprep.subr.bf16.mxu1 %v1691_v63 }
 0x219   :  { %1516 = vmatpush3.bf16.msra.mxu1 %v1691_v63  ;;  %v1703_v63 = vld [vmem:[%s2146_s6 + $0x80] sm:$0xff]  }
 0x21a   :  { %1517 = vmatprep.subr.bf16.mxu1 %v1692_v0 }
 0x21d   :  { %1518 = vmatpush3.bf16.msra.mxu1 %v1692_v0  ;;  %v1704_v0 = vld [vmem:[%s2146_s6 + $0x88] sm:$0xff]  }
 0x21e   :  { %1519 = vmatprep.subr.bf16.mxu1 %v1693_v1 }
 0x221   :  { %1520 = vmatpush3.bf16.msra.mxu1 %v1693_v1  ;;  %v1705_v1 = vld [vmem:[%s2146_s6 + $0x90] sm:$0xff]  }
 0x222   :  { %1521 = vmatprep.subr.bf16.mxu1 %v1694_v2 }
 0x225   :  { %1522 = vmatpush3.bf16.msra.mxu1 %v1694_v2  ;;  %v1708_v2 = vld [vmem:[%s2146_s6 + $0xa8] sm:$0xff]  }
 0x226   :  { %1527 = vmatprep.subr.bf16.mxu1 %v1695_v4 }
 0x2db   :  { %v605_v7 = vpop.f32.mrb[0].mxu1 }
 0x2dc   :  { %v616_v8 = vmul.f32 %v1274_v5, %v605_v7  ;;  %v1506_v9 = vpop.f32.mrb[1].mxu1  ;;  %v1710_v5 = vld [vmem:[%s2146_s6 + $0xb8] sm:$0xff]  }
 0x2de   :  { %v619_v10 = vrot.slane %v616_v8, 1  ;;  %v626_v11 = vrot.slane %v616_v8, %v625_v6 }
 0x2e0   :  { %v621_v15 = vmul.f32 %v619_v10, %v605_v7  ;;  %v629_v16 = vmul.f32 %v1955_v19, %v626_v11  ;;  %v630_v18 = vmul.f32 %v1959_v21, %v626_v11  ;;  %v627_v23 = vmul.f32 %v626_v11, %v1957_v20 }
 0x2e1   :  { %v628_v24 = vmul.f32 %v626_v11, %v1961_v22  ;;  %v1696_v22 = vld [vmem:[%s2146_s6 + $0x8] sm:$0xff]  }
 0x2e2   :  { %v622_v25 = vsub.f32 %v617_v12, %v621_v15 }
 0x2e4   :  { %v635_v26 = vrot.slane %v622_v25, %v634_v13 }
 0x2e6   :  { %v637_v27 = vadd.f32 %v635_v26, %v627_v23  ;;  %v638_v28 = vadd.f32 %v635_v26, %v628_v24  ;;  %v639_v29 = vadd.f32 %v635_v26, %v629_v16  ;;  %v640_v30 = vadd.f32 %v635_v26, %v630_v18 }
 0x2e8   :  { %v641_v31 = vmax.f32 %v637_v27, 0.0  ;;  %v642_v32 = vmax.f32 %v638_v28, 0.0  ;;  %v643_v34 = vmax.f32 %v639_v29, 0.0  ;;  %v644_v36 = vmax.f32 %v640_v30, 0.0 }
 0x2ea   :  { %v687_v37 = vpack.c.bf16 %v642_v32, %v641_v31  ;;  %v647_v19 = vrot.slane %v643_v34, 7  ;;  %v660_v38 = vrot.slane %v644_v36, 1  ;;  %v688_v21 = vpack.c.bf16 %v644_v36, %v643_v34 }
 0x2eb   :  { %v645_v39 = vrot.slane %v641_v31, 7  ;;  %v646_v20 = vrot.slane %v642_v32, 7  ;;  %v648_v40 = vrot.slane %v644_v36, 7  ;;  %v657_v41 = vrot.slane %v641_v31, 1 }
 0x2ec   :  { %1523 = vmatprep.mubr.bf16.mxu1 %v687_v37  ;;  %v658_v42 = vrot.slane %v642_v32, 1  ;;  %v659_v43 = vrot.slane %v643_v34, 1 }
 0x2ed   :  { %1524 = vmatmul.mubr.bf16.vlgmr.msra.gmra.mrb[4].mxu1 %v688_v21  ;;  %v651_v44 = vsel %vm119_vm1, %v645_v39, %v646_v20  ;;  %v652_v45 = vsel %vm119_vm1, %v648_v40, %v645_v39  ;;  %v649_v46 = vsel %vm119_vm1, %v647_v19, %v648_v40  ;;  %v650_v47 = vsel %vm119_vm1, %v646_v20, %v647_v19 }
 0x2ee   :  { %1528 = vmatpush3.bf16.msra.mxu1 %v1695_v4  ;;  %v1308_v49 = vpack.c.bf16 %v651_v44, %v652_v45  ;;  %v1311_v51 = vpack.c.bf16 %v649_v46, %v650_v47  ;;  %v662_v52 = vsel %vm140_vm3, %v658_v42, %v659_v43  ;;  %v663_v53 = vsel %vm140_vm3, %v657_v41, %v658_v42  ;;  %v1709_v4 = vld [vmem:[%s2146_s6 + $0xb0] sm:$0xff]   ;;  %v1344_v45 = vld [vmem:[%s2149_s7] ss:$0 sm:$0xff] }
 0x2ef   :  { %1529 = vmatprep.subr.bf16.mxu1 %v1696_v22  ;;  %v1338_v54 = vpack.c.bf16 %v662_v52, %v663_v53  ;;  %v661_v55 = vsel %vm140_vm3, %v659_v43, %v660_v38  ;;  %v664_v56 = vsel %vm140_vm3, %v660_v38, %v657_v41  ;;  %v1203_v53 = vld [vmem:[%s2150_s8] sm:$0x1] }
 0x2f0   :  { %1543 = vmatprep.mubr.msk.bf16.mxu1 %vm1307_vm11, %v1308_v49  ;;  %v1341_v57 = vpack.c.bf16 %v664_v56, %v661_v55 }
 0x2f2   :  { %1530 = vmatpush3.bf16.msra.mxu1 %v1696_v22 }
 0x2f3   :  { %1531 = vmatprep.subr.bf16.mxu1 %v1697_v14 }
 0x2f6   :  { %1532 = vmatpush3.bf16.msra.mxu1 %v1697_v14 }
 0x2f7   :  { %1533 = vmatprep.subr.bf16.mxu1 %v1698_v58 }
 0x2fa   :  { %1534 = vmatpush3.bf16.msra.mxu1 %v1698_v58 }
 0x2fb   :  { %1535 = vmatprep.subr.bf16.mxu1 %v1699_v59 }
 0x2fe   :  { %1536 = vmatpush3.bf16.msra.mxu1 %v1699_v59 }
 0x2ff   :  { %1537 = vmatprep.subr.bf16.mxu1 %v1700_v60 }
 0x302   :  { %1538 = vmatpush3.bf16.msra.mxu1 %v1700_v60 }
 0x303   :  { %1539 = vmatprep.subr.bf16.mxu1 %v1701_v61 }
 0x306   :  { %1540 = vmatpush3.bf16.msra.mxu1 %v1701_v61 }
 0x307   :  { %1541 = vmatprep.subr.bf16.mxu1 %v1702_v62 }
 0x30a   :  { %1542 = vmatpush3.bf16.msra.mxu1 %v1702_v62 }
 0x30b   :  { %1547 = vmatprep.subr.bf16.mxu1 %v1703_v63 }
 0x30d   :  { %1544 = vmatmul.mubr.msk.bf16.vlgmr.msra.gmra.mrb[4].mxu1 %vm1310_vm12, %v1311_v51 }
 0x30e   :  { %1548 = vmatpush3.bf16.msra.mxu1 %v1703_v63  ;;  %1563 = vmatprep.mubr.msk.bf16.mxu1 %vm1337_vm13, %v1338_v54 }
 0x30f   :  { %1549 = vmatprep.subr.bf16.mxu1 %v1704_v0 }
 0x312   :  { %1550 = vmatpush3.bf16.msra.mxu1 %v1704_v0 }
 0x313   :  { %1551 = vmatprep.subr.bf16.mxu1 %v1705_v1 }
 0x316   :  { %1552 = vmatpush3.bf16.msra.mxu1 %v1705_v1 }
 0x317   :  { %1553 = vmatprep.subr.bf16.mxu1 %v1706_v33 }
 0x31a   :  { %1554 = vmatpush3.bf16.msra.mxu1 %v1706_v33 }
 0x31b   :  { %1555 = vmatprep.subr.bf16.mxu1 %v1707_v35 }
 0x31e   :  { %1556 = vmatpush3.bf16.msra.mxu1 %v1707_v35 }
 0x31f   :  { %1557 = vmatprep.subr.bf16.mxu1 %v1708_v2 }
 0x322   :  { %1558 = vmatpush3.bf16.msra.mxu1 %v1708_v2 }
 0x323   :  { %1559 = vmatprep.subr.bf16.mxu1 %v1709_v4 }
 0x326   :  { %1560 = vmatpush3.bf16.msra.mxu1 %v1709_v4 }
 0x327   :  { %1561 = vmatprep.subr.bf16.mxu1 %v1710_v5 }
 0x32a   :  { %1562 = vmatpush3.bf16.msra.mxu1 %v1710_v5 }
 0x32b   :  { %1602 = vmatprep.subr.mxu1 %v1717_v17 }
 0x32d   :  { %1564 = vmatmul.mubr.msk.bf16.vlgmr.msra.gmra.mrb[4].mxu1 %vm1340_vm14, %v1341_v57 }
 0x32e   :  { %1603 = vmatpush3.msra.mxu1 %v1992_v48  ;;  %1604 = vmatprep.mubr.msk.f32.mxu1 %vm1716_vm7, %v1717_v17 }
 0x400   :  { %v1565_v7 = vpop.f32.mrb[4].mxu1 }
 0x401   :  { %v1001_v8 = vpop.f32.mrb[5].mxu1  ;;  %v1031_v16 = vmul.f32 %v1565_v7, %v1565_v7 }
 0x402   :  { %v1566_v9 = vpop.f32.mrb[6].mxu1  ;;  %v1029_v11 = vmul.f32 %v1001_v8, %v1001_v8 }
 0x403   :  { %v1004_v10 = vpop.f32.mrb[7].mxu1  ;;  %v1032_v50 = vmul.f32 %v1566_v9, %v1566_v9 }
 0x404   :  { %v1020_v12 = vadd.f32 %v1004_v10, %v1001_v8  ;;  %v1030_v15 = vmul.f32 %v1004_v10, %v1004_v10 }
 0x406   :  { %v1021_v18 = vadd.f32 %v1565_v7, %v1020_v12  ;;  %v1033_v23 = vadd.f32 %v1030_v15, %v1029_v11 }
 0x408   :  { %v1022_v24 = vadd.f32 %v1566_v9, %v1021_v18  ;;  %v1034_v25 = vadd.f32 %v1033_v23, %v1031_v16 }
 0x40a   :  { %v1023_v26 = vrot.slane %v1022_v24, 4  ;;  %v1035_v27 = vadd.f32 %v1034_v25, %v1032_v50 }
 0x40c   :  { %v1024_v28 = vadd.f32 %v1023_v26, %v1022_v24  ;;  %v1036_v48 = vrot.slane %v1035_v27, 4 }
 0x40e   :  { %v1025_v29 = vrot.slane %v1024_v28, 2  ;;  %v1037_v30 = vadd.f32 %v1036_v48, %v1035_v27 }
 0x410   :  { %v1026_v17 = vadd.f32 %v1025_v29, %v1024_v28  ;;  %v1038_v31 = vrot.slane %v1037_v30, 2 }
 0x412   :  { %v1027_v32 = vrot.slane %v1026_v17, 1  ;;  %v1039_v34 = vadd.f32 %v1038_v31, %v1037_v30 }
 0x414   :  { %v1040_v36 = vrot.slane %v1039_v34, 1  ;;  %v1028_v37 = vadd.f32 %v1027_v32, %v1026_v17 }
 0x416   :  { %v1041_v19 = vadd.f32 %v1040_v36, %v1039_v34 }
 0x418   :  { %v1042_v38 = vsel %vm453_vm8, %v1028_v37, %v1041_v19 }
 0x419   :  { %1600 = vmatmul.mubr.f32.vlgmr.msra.gmra.mrb[6].mxu0 %v1042_v38 }
 0x4ec   :  { %v1109_v21 = vpop.f32.mrb[6].mxu0 }
 0x4ed   :  { %v1113_v39 = vmul.f32 0.001953125, %v1109_v21  ;;  %v1601_v20 = vpop.f32.mrb[7].mxu0 }
 0x4ef   :  { %v1114_v40 = vmul.f32 %v1113_v39, %v1113_v39 }
 0x4f1   :  { %v1116_v22 = vrot.slane %v1114_v40, 7 }
 0x4f3   :  { %v1118_v41 = vsub.f32 %v1113_v39, %v1116_v22 }
 0x4f5   :  { %v1119_v42 = vadd.f32 1e-05, %v1118_v41 }
 0x4f7   :  { %1713 = vrsqrt.f32 %v1119_v42 }
 0x501   :  { %v1714_v43 = vpop.eup %1713 }
 0x502   :  { %v1121_v44 = vsel %vm453_vm8, %v1113_v39, %v1714_v43 }
 0x503   :  { %1605 = vmatmul.mubr.msk.f32.vlgmr.msra.gmra.mrb[2].mxu1 %vm535_vm9, %v1121_v44 }
 0x5d6   :  { %v1191_v46 = vpop.f32.mrb[2].mxu1 }
 0x5d7   :  { %v1202_v47 = vmul.f32 %v1344_v45, %v1191_v46  ;;  %v1606_v49 = vpop.f32.mrb[3].mxu1 }
 0x5d9   :  { %v1205_v51 = vrot.slane %v1202_v47, 1  ;;  %v1212_v52 = vrot.slane %v1202_v47, %v625_v6 }
 0x5db   :  { %v1207_v14 = vmul.f32 %v1205_v51, %v1191_v46  ;;  %v1213_v54 = vmul.f32 %v1212_v52, %v1001_v8  ;;  %v1214_v55 = vmul.f32 %v1212_v52, %v1004_v10  ;;  %v1215_v56 = vmul.f32 %v1565_v7, %v1212_v52 }
 0x5dc   :  { %v1216_v57 = vmul.f32 %v1566_v9, %v1212_v52 }
 0x5dd   :  { %v1208_v58 = vsub.f32 %v1203_v53, %v1207_v14 }
 0x5df   :  { %v1221_v59 = vrot.slane %v1208_v58, %v634_v13 }
 0x5e1   :  { %v1223_v60 = vadd.f32 %v1221_v59, %v1213_v54  ;;  %v1224_v61 = vadd.f32 %v1221_v59, %v1214_v55  ;;  %v1225_v62 = vadd.f32 %v1221_v59, %v1215_v56  ;;  %v1226_v63 = vadd.f32 %v1221_v59, %v1216_v57 }
 0x5e3   :  { %v1227_v0 = vmax.f32 %v1223_v60, 0.0  ;;  %v1228_v1 = vmax.f32 %v1224_v61, 0.0  ;;  %v1229_v6 = vmax.f32 %v1225_v62, 0.0  ;;  %v1230_v33 = vmax.f32 %v1226_v63, 0.0 }
 0x5e5   :  { %1231 = vst [vmem:[%s2151_s9] sm:$0xff] %v1227_v0  ;;  %1232 = vst [vmem:[%s2151_s9 + $0x8] sm:$0xff] %v1228_v1 }
 0x5e6   :  { %1233 = vst [vmem:[%s2151_s9 + $0x10] sm:$0xff] %v1229_v6  ;;  %1234 = vst [vmem:[%s2151_s9 + $0x18] sm:$0xff] %v1230_v33 }

</bundles_post_ra>
